<compile_context>
chip_gen: v7x
topology: tpu7x:2x2x1
jax: 0.10.0
libtpu: 0.0.40
codegen_flags: <defaults>
</compile_context>

<pallas_src>
import functools

import jax
import jax.numpy as jnp
from jax.experimental import pallas as pl
from jax.experimental.pallas import tpu as pltpu


def _round_up(x, m):
    return ((x + m - 1) // m) * m


# ----------------------------------------------------------------------------
# Collocation / boundary generation (lane-major; shared by the Pallas path and
# the pure-JAX reference so both consume identical random values).
# ----------------------------------------------------------------------------
def gen_collocation_T(key, n_feat, n_pad):
    # (F, n_pad): column j is one collocation sample; row 0 is the P feature.
    return jax.random.normal(key, (n_feat, n_pad), jnp.float32)


def gen_boundary_T(key, rss_1m, mean_input, std_input, n_feat, n_pad):
    p0 = (jnp.asarray(rss_1m, jnp.float32).reshape(-1)[0:1]
          - mean_input[0:1]) / std_input[0:1]
    p0 = jnp.broadcast_to(p0.reshape(1, 1), (1, n_pad)).astype(jnp.float32)
    other = jax.random.normal(key, (n_feat - 1, n_pad), jnp.float32)
    return jnp.concatenate([p0, other], axis=0)


# ----------------------------------------------------------------------------
# Pallas kernels
# ----------------------------------------------------------------------------
def _fused_loss_kernel(params_ref, xT_ref, tT_ref, w1T_ref, b1T_ref, w2T_ref,
                       out_ref, *, n_col, n_pad, n_batch):
    """Lane-major fused forward over [colloc | boundary | data] plus the
    forward-mode d(.)/dP tangent, all four loss reductions, and the
    lambda-weighted total -> single (1,1) output."""
    ax_n = params_ref[0]
    ay_n = params_ref[1]
    s_x = params_ref[2]          # std_t0 / std_in0
    s_y = params_ref[3]          # std_t1 / std_in0
    s_a = params_ref[4]          # std_in1 / std_in0
    st0 = params_ref[5]
    off_x = params_ref[6]        # mean_t0 - anchor_x
    st1 = params_ref[7]
    off_y = params_ref[8]        # mean_t1 - anchor_y
    k = params_ref[9]
    d0_sq = params_ref[10]
    b2_x = params_ref[11]
    b2_y = params_ref[12]
    w_data = params_ref[13]      # lambda_data / (2B)
    w_rss = params_ref[14]       # lambda_rss / N
    w_az = params_ref[15]        # lambda_azimuth / N
    w_bc = params_ref[16]        # lambda_bc / N

    w1T = w1T_ref[...]                                     # (H, F)
    # Single lane-major MLP hidden pass over all stacked samples.
    hT = jnp.tanh(jnp.dot(w1T, xT_ref[...],
                          preferred_element_type=jnp.float32)
                  + b1T_ref[...])                          # (H, R_pad)

    # Forward-mode tangent w.r.t. input feature 0 (== autograd.grad wrt P),
    # collocation block only (lane-aligned slice: n_pad is a multiple of 128).
    hT_c = hT[:, 0:n_pad]                                  # (H, Npad)
    t_hT = (1.0 - hT_c * hT_c) * w1T[:, 0:1]               # (H, Npad)

    # Two small MXU passes (no materialized concat of hT / t_hT).
    w2T = w2T_ref[...]                                     # (8, H), rows 2..7 zero
    zz = jnp.dot(w2T, hT, preferred_element_type=jnp.float32)    # (8, R_pad)
    tz = jnp.dot(w2T, t_hT, preferred_element_type=jnp.float32)  # (8, Npad)

    # ---------------- collocation (RSS + azimuth) residuals ----------------
    x_n = zz[0:1, 0:n_pad] + b2_x
    y_n = zz[1:2, 0:n_pad] + b2_y
    dx_raw = tz[0:1, :]
    dy_raw = tz[1:2, :]

    vx = x_n - ax_n
    vy = y_n - ay_n
    # d/dP atan(vy/vx) = (vx*dy - vy*dx) / (vx^2 + vy^2); same 1/dist semantics
    # as the PyTorch reference -> no epsilon added.
    # TODO(synk): switch to pl.reciprocal(..., approx=True) (EUP slot) once the
    # azimuth term is validated against the 1e-3/1e-4 tolerance.
    da_raw = (vx * dy_raw - vy * dx_raw) * pl.reciprocal(vx * vx + vy * vy,
                                                         approx=False)
    dx_dP = s_x * dx_raw
    dy_dP = s_y * dy_raw
    da_dP = s_a * da_raw

    xc = st0 * x_n + off_x
    yc = st1 * y_n + off_y
    inv_d2 = pl.reciprocal(xc * xc + yc * yc, approx=False)   # reused twice

    res_x = dx_dP + k * xc
    res_y = dy_dP + k * yc
    res_az = da_dP - (xc * inv_d2) * dy_dP + (yc * inv_d2) * dx_dP

    # ---------------- boundary residual -------------------------------------
    xb = st0 * (zz[0:1, n_pad:2 * n_pad] + b2_x) + off_x
    yb = st1 * (zz[1:2, n_pad:2 * n_pad] + b2_y) + off_y
    res_b = xb * xb + yb * yb - d0_sq

    # ---------------- data MSE residual --------------------------------------
    d_lo = 2 * n_pad
    diff_x = zz[0:1, d_lo:] + b2_x - tT_ref[0:1, :]
    diff_y = zz[1:2, d_lo:] + b2_y - tT_ref[1:2, :]
    data_sq = diff_x * diff_x + diff_y * diff_y            # (1, Bpad)

    # ---------------- masked, lambda-weighted reductions --------------------
    lane_n = jax.lax.broadcasted_iota(jnp.int32, (1, n_pad), 1)
    lane_b = jax.lax.broadcasted_iota(jnp.int32, (1, data_sq.shape[1]), 1)

    phys = (w_rss * (res_x * res_x + res_y * res_y)
            + w_az * (res_az * res_az)
            + w_bc * (res_b * res_b))                      # (1, Npad)
    phys = jnp.where(lane_n < n_col, phys, 0.0)
    data_sq = jnp.where(lane_b < n_batch, data_sq, 0.0)

    out_ref[...] = (jnp.sum(phys, keepdims=True)
                    + w_data * jnp.sum(data_sq, keepdims=True))


def _data_loss_kernel(xT_ref, tT_ref, w1T_ref, b1T_ref, w2T_ref, b2T_ref,
                      out_ref):
    """MSE(model(inputs), targets) only (used when all physics lambdas == 0)."""
    hT = jnp.tanh(jnp.dot(w1T_ref[...], xT_ref[...],
                          preferred_element_type=jnp.float32) + b1T_ref[...])
    zT = jnp.dot(w2T_ref[...], hT,
                 preferred_element_type=jnp.float32) + b2T_ref[...]
    t = tT_ref[...]
    diff = zT[0:t.shape[0], :] - t
    out_ref[...] = jnp.sum(diff * diff, keepdims=True) * (
        1.0 / (t.shape[0] * t.shape[1]))


# ----------------------------------------------------------------------------
# pallas_call wrappers
# ----------------------------------------------------------------------------
_VMEM = pl.BlockSpec(memory_space=pltpu.MemorySpace.VMEM)
_SMEM = pl.BlockSpec(memory_space=pltpu.MemorySpace.SMEM)
_S11 = jax.ShapeDtypeStruct((1, 1), jnp.float32)
# TODO(synk): add a 1-D lane grid with per-block partial sums +
# dimension_semantics=("parallel",) (v7x dual-TC) and bf16 MXU operands once
# n_collocation / hidden size are scaled up; a single full-array block is
# optimal at these sizes.


def _pallas_fused_loss(params, xT, tT, w1T, b1T, w2T, *, n_col, n_pad, n_batch):
    kern = functools.partial(_fused_loss_kernel, n_col=n_col, n_pad=n_pad,
                             n_batch=n_batch)
    out = pl.pallas_call(
        kern,
        out_shape=_S11,
        in_specs=[_SMEM] + [_VMEM] * 5,
        out_specs=_VMEM,
    )(params, xT, tT, w1T, b1T, w2T)
    return out[0, 0]


def _pallas_data_loss(xT, targetsT, w1T, b1T, w2T, b2T):
    out = pl.pallas_call(
        _data_loss_kernel,
        out_shape=_S11,
        in_specs=[_VMEM] * 6,
        out_specs=_VMEM,
    )(xT, targetsT, w1T, b1T, w2T, b2T)
    return out[0, 0]


def _prep_weights(w1, b1, w2, b2):
    """Transpose to lane-major orientation and zero-pad to tile-friendly sizes
    (hidden dim -> multiple of 8 sublanes, output dim 2 -> 8). Numerically a
    no-op: padded rows/cols are zero and never read back."""
    h = w1.shape[1]
    hp = _round_up(h, 8)
    w1t = w1.T                       # (H, F)
    b1t = b1.reshape(h, 1)           # (H, 1)
    w2t = w2.T                       # (2, H)
    b2t = b2.reshape(-1, 1)          # (2, 1)
    if hp > h:
        w1t = jnp.pad(w1t, ((0, hp - h), (0, 0)))
        b1t = jnp.pad(b1t, ((0, hp - h), (0, 0)))
        w2t = jnp.pad(w2t, ((0, 0), (0, hp - h)))
    w2t = jnp.pad(w2t, ((0, 8 - w2t.shape[0]), (0, 0)))
    b2t = jnp.pad(b2t, ((0, 8 - b2t.shape[0]), (0, 0)))
    return w1t, b1t, w2t, b2t


# ----------------------------------------------------------------------------
# PositionLoss (jitted glue around the fused kernel)
# ----------------------------------------------------------------------------
def _as_f32_vec(v, default, min_len):
    a = jnp.asarray(default if v is None else v, jnp.float32)
    if a.ndim == 0:
        a = jnp.broadcast_to(a, (min_len,))
    return a


class PositionLossPallas:
    def __init__(self, lambda_data, lambda_rss, lambda_azimuth, lambda_bc,
                 n_collocation=1000, mean_input=None, std_input=None,
                 mean_target=None, std_target=None):
        if lambda_data < 0.0 or lambda_rss < 0.0 or lambda_bc < 0.0:
            raise ValueError("Lambda weights must be non-negative.")
        self.lambda_data = float(lambda_data)
        self.lambda_rss = float(lambda_rss)
        self.lambda_azimuth = float(lambda_azimuth)
        self.lambda_bc = float(lambda_bc)
        self.n_collocation = int(n_collocation)
        self.mean_input = _as_f32_vec(mean_input, 0.0, 2)
        self.std_input = _as_f32_vec(std_input, 1.0, 2)
        self.mean_target = _as_f32_vec(mean_target, 0.0, 2)
        self.std_target = _as_f32_vec(std_target, 1.0, 2)
        # jit the entire forward (RNG glue + kernel): one compiled program.
        self._jit_forward = jax.jit(self._forward)

    def __call__(self, model, inputs, targets, key):
        return self._jit_forward(model, inputs, targets, key)

    def _forward(self, model, inputs, targets, key):
        w1 = model["w1"].astype(jnp.float32)
        b1 = model["b1"].astype(jnp.float32)
        w2 = model["w2"].astype(jnp.float32)
        b2 = model["b2"].astype(jnp.float32)
        # TODO(synk): hoist _prep_weights out of the per-call path when the same
        # weights are evaluated repeatedly in a training loop (pre-pad once).
        w1t, b1t, w2t, b2t = _prep_weights(w1, b1, w2, b2)

        inputs = inputs.astype(jnp.float32)
        targets = targets.astype(jnp.float32)

        if (self.lambda_rss == 0.0 and self.lambda_azimuth == 0.0
                and self.lambda_bc == 0.0):
            return _pallas_data_loss(inputs.T, targets.T, w1t, b1t, w2t, b2t)

        batch, n_feat = inputs.shape
        n = self.n_collocation
        n_pad = _round_up(n, 128)          # lane-aligned collocation width
        b_pad = _round_up(batch, 128)      # lane-aligned data width

        # TODO(synk): generate collocation/boundary randoms inside the kernel
        # with pltpu.prng_seed + pltpu.stateful_normal to skip this host-side
        # RNG / concat and its HBM round-trip (changes the RNG stream).
        k_col, k_bnd = jax.random.split(key)
        colloc_t = gen_collocation_T(k_col, n_feat, n_pad)                # (F, Npad)
        bnd_t = gen_boundary_T(k_bnd, model["rss_1m"], self.mean_input,
                               self.std_input, n_feat, n_pad)             # (F, Npad)
        data_t = jnp.pad(inputs.T, ((0, 0), (0, b_pad - batch)))          # (F, Bpad)
        x_t = jnp.concatenate([colloc_t, bnd_t, data_t], axis=1)          # (F, R_pad)
        t_t = jnp.pad(targets.T, ((0, 0), (0, b_pad - batch)))            # (2, Bpad)

        mt0, mt1 = self.mean_target[0], self.mean_target[1]
        st0, st1 = self.std_target[0], self.std_target[1]
        si0, si1 = self.std_input[0], self.std_input[1]
        anchor_x = jnp.asarray(model["anchor_x"], jnp.float32)
        anchor_y = jnp.asarray(model["anchor_y"], jnp.float32)
        k = jnp.asarray(model["k"], jnp.float32).reshape(-1)[0]
        d_0 = jnp.asarray(model["d_0"], jnp.float32).reshape(-1)[0]
        b2f = b2.reshape(-1)

        # Pre-derived scalars + lambda/N folding: no in-kernel scalar divides,
        # and the kernel emits the final weighted total directly.
        params = jnp.stack([
            (anchor_x - mt0) / st0,                      # 0  ax_n
            (anchor_y - mt1) / st1,                      # 1  ay_n
            st0 / si0,                                   # 2  s_x
            st1 / si0,                                   # 3  s_y
            si1 / si0,                                   # 4  s_a
            st0,                                         # 5
            mt0 - anchor_x,                              # 6  off_x
            st1,                                         # 7
            mt1 - anchor_y,                              # 8  off_y
            k,                                           # 9
            d_0 * d_0,                                   # 10
            b2f[0],                                      # 11 b2_x
            b2f[1],                                      # 12 b2_y
            jnp.float32(self.lambda_data / (2.0 * batch)),   # 13
            jnp.float32(self.lambda_rss / n),                # 14
            jnp.float32(self.lambda_azimuth / n),            # 15
            jnp.float32(self.lambda_bc / n),                 # 16
        ]).astype(jnp.float32)

        return _pallas_fused_loss(params, x_t, t_t, w1t, b1t, w2t,
                                  n_col=n, n_pad=n_pad, n_batch=batch)


# ----------------------------------------------------------------------------
# Pure-JAX reference (mirrors the PyTorch forward, uses jax.jvp for the grads;
# consumes the SAME random collocation / boundary points as the kernel).
# ----------------------------------------------------------------------------
def _mlp(x, m):
    return jnp.tanh(x @ m["w1"] + m["b1"]) @ m["w2"] + m["b2"]


def _reference_loss(loss_obj, model, inputs, targets, key):
    z = _mlp(inputs, model)
    data_loss = jnp.mean((z - targets) ** 2)

    n = loss_obj.n_collocation
    n_feat = inputs.shape[-1]
    n_pad = _round_up(n, 128)
    k_col, k_bnd = jax.random.split(key)
    colloc = gen_collocation_T(k_col, n_feat, n_pad)[:, :n].T
    bndc = gen_boundary_T(k_bnd, model["rss_1m"], loss_obj.mean_input,
                          loss_obj.std_input, n_feat, n_pad)[:, :n].T

    mt, st, si = loss_obj.mean_target, loss_obj.std_target, loss_obj.std_input
    ax_n = (model["anchor_x"] - mt[0]) / st[0]
    ay_n = (model["anchor_y"] - mt[1]) / st[1]

    def g(c):
        zc = _mlp(c, model)
        x_n = zc[:, 0:1]
        y_n = zc[:, 1:2]
        a = jnp.arctan((y_n - ay_n) / (x_n - ax_n))
        return x_n, y_n, a

    tangent = jnp.zeros_like(colloc).at[:, 0].set(1.0)
    (x_n, y_n, _), (dx, dy, da) = jax.jvp(g, (colloc,), (tangent,))

    dx_dp = st[0] / si[0] * dx
    dy_dp = st[1] / si[0] * dy
    da_dp = si[1] / si[0] * da

    xc = st[0] * x_n + mt[0] - model["anchor_x"]
    yc = st[1] * y_n + mt[1] - model["anchor_y"]
    dist2 = xc ** 2 + yc ** 2
    res_x = dx_dp + model["k"] * xc
    res_y = dy_dp + model["k"] * yc
    res_az = da_dp - (xc / dist2) * dy_dp + (yc / dist2) * dx_dp
    rss_loss = jnp.mean(res_x ** 2) + jnp.mean(res_y ** 2)
    az_loss = jnp.mean(res_az ** 2)

    zb = _mlp(bndc, model)
    xb = st[0] * zb[:, 0:1] + mt[0] - model["anchor_x"]
    yb = st[1] * zb[:, 1:2] + mt[1] - model["anchor_y"]
    res_b = xb ** 2 + yb ** 2 - model["d_0"] ** 2
    bnd_loss = jnp.mean(res_b ** 2)

    return (loss_obj.lambda_data * data_loss + loss_obj.lambda_rss * rss_loss
            + loss_obj.lambda_azimuth * az_loss + loss_obj.lambda_bc * bnd_loss)


# ----------------------------------------------------------------------------
# main
# ----------------------------------------------------------------------------
if __name__ == "__main__":
    B, F, H, N_COLLOC = 16, 8, 32, 1000   # batch, features, hidden, collocation

    key = jax.random.PRNGKey(0)
    k_in, k_tg, k_w1, k_w2, k_col = jax.random.split(key, 5)

    inputs = jax.random.normal(k_in, (B, F), jnp.float32)
    targets = jax.random.normal(k_tg, (B, 2), jnp.float32)

    # Deterministic synthetic model (MLP + physics attributes).
    model = {
        "w1": 0.3 * jax.random.normal(k_w1, (F, H), jnp.float32),
        "b1": jnp.zeros((1, H), jnp.float32),
        "w2": 0.3 * jax.random.normal(k_w2, (H, 2), jnp.float32),
        "b2": jnp.zeros((1, 2), jnp.float32),
        "anchor_x": jnp.float32(1.0),
        "anchor_y": jnp.float32(2.0),
        "k": jnp.array([0.1], jnp.float32),
        "rss_1m": jnp.array([-40.0], jnp.float32),
        "d_0": jnp.float32(1.0),
    }

    loss_fn = PositionLossPallas(
        lambda_data=1.0, lambda_rss=0.5, lambda_azimuth=0.3, lambda_bc=0.2,
        n_collocation=N_COLLOC,
        mean_input=jnp.linspace(-45.0, -30.0, F),
        std_input=jnp.full((F,), 5.0),
        mean_target=jnp.array([0.5, -0.3]),
        std_target=jnp.array([2.0, 1.5]),
    )

    total_loss = loss_fn(model, inputs, targets, k_col)
    total_loss = jax.block_until_ready(total_loss)

    ref_loss = jax.jit(functools.partial(_reference_loss, loss_fn))(
        model, inputs, targets, k_col)
    ref_loss = jax.block_until_ready(ref_loss)

    assert jnp.isfinite(total_loss), f"non-finite loss: {total_loss}"
    assert jnp.allclose(total_loss, ref_loss, rtol=1e-3, atol=1e-4), (
        float(total_loss), float(ref_loss))
    print("KERNEL_OK")
</pallas_src>

<mosaic_0001>
module attributes {stable_mosaic.version = 11 : i64} {
  func.func @_fused_loss_kernel(%arg0: memref<17xf32, #tpu.memory_space<smem>>, %arg1: memref<8x2176xf32, #tpu.memory_space<vmem>>, %arg2: memref<2x128xf32, #tpu.memory_space<vmem>>, %arg3: memref<32x8xf32, #tpu.memory_space<vmem>>, %arg4: memref<32x1xf32, #tpu.memory_space<vmem>>, %arg5: memref<8x32xf32, #tpu.memory_space<vmem>>, %arg6: memref<1x1xf32, #tpu.memory_space<vmem>>) attributes {dimension_semantics = [], scalar_prefetch = 0 : i64, scratch_operands = 0 : i64, tpu.core_type = #tpu.core_type<tc>} {
    %c0 = arith.constant 0 : index
    %0 = memref.load %arg0[%c0] : memref<17xf32, #tpu.memory_space<smem>>
    %c1 = arith.constant 1 : index
    %1 = memref.load %arg0[%c1] : memref<17xf32, #tpu.memory_space<smem>>
    %c2 = arith.constant 2 : index
    %2 = memref.load %arg0[%c2] : memref<17xf32, #tpu.memory_space<smem>>
    %c3 = arith.constant 3 : index
    %3 = memref.load %arg0[%c3] : memref<17xf32, #tpu.memory_space<smem>>
    %c4 = arith.constant 4 : index
    %4 = memref.load %arg0[%c4] : memref<17xf32, #tpu.memory_space<smem>>
    %c5 = arith.constant 5 : index
    %5 = memref.load %arg0[%c5] : memref<17xf32, #tpu.memory_space<smem>>
    %c6 = arith.constant 6 : index
    %6 = memref.load %arg0[%c6] : memref<17xf32, #tpu.memory_space<smem>>
    %c7 = arith.constant 7 : index
    %7 = memref.load %arg0[%c7] : memref<17xf32, #tpu.memory_space<smem>>
    %c8 = arith.constant 8 : index
    %8 = memref.load %arg0[%c8] : memref<17xf32, #tpu.memory_space<smem>>
    %c9 = arith.constant 9 : index
    %9 = memref.load %arg0[%c9] : memref<17xf32, #tpu.memory_space<smem>>
    %c10 = arith.constant 10 : index
    %10 = memref.load %arg0[%c10] : memref<17xf32, #tpu.memory_space<smem>>
    %c11 = arith.constant 11 : index
    %11 = memref.load %arg0[%c11] : memref<17xf32, #tpu.memory_space<smem>>
    %c12 = arith.constant 12 : index
    %12 = memref.load %arg0[%c12] : memref<17xf32, #tpu.memory_space<smem>>
    %c13 = arith.constant 13 : index
    %13 = memref.load %arg0[%c13] : memref<17xf32, #tpu.memory_space<smem>>
    %c14 = arith.constant 14 : index
    %14 = memref.load %arg0[%c14] : memref<17xf32, #tpu.memory_space<smem>>
    %c15 = arith.constant 15 : index
    %15 = memref.load %arg0[%c15] : memref<17xf32, #tpu.memory_space<smem>>
    %c16 = arith.constant 16 : index
    %16 = memref.load %arg0[%c16] : memref<17xf32, #tpu.memory_space<smem>>
    %c0_0 = arith.constant 0 : index
    %c0_1 = arith.constant 0 : index
    %17 = vector.load %arg3[%c0_0, %c0_1] : memref<32x8xf32, #tpu.memory_space<vmem>>, vector<32x8xf32>
    %c0_2 = arith.constant 0 : index
    %c0_3 = arith.constant 0 : index
    %18 = vector.load %arg1[%c0_2, %c0_3] : memref<8x2176xf32, #tpu.memory_space<vmem>>, vector<8x2176xf32>
    %cst = arith.constant dense<0.000000e+00> : vector<32x2176xf32>
    %19 = tpu.matmul %17, %18, %cst {dimension_numbers = #tpu.dot_dimension_numbers<[1], [0], [0], [1], [0, 0, 1, 1], [], []>} : vector<32x8xf32>, vector<8x2176xf32>, vector<32x2176xf32> -> vector<32x2176xf32>
    %c0_4 = arith.constant 0 : index
    %c0_5 = arith.constant 0 : index
    %20 = vector.load %arg4[%c0_4, %c0_5] : memref<32x1xf32, #tpu.memory_space<vmem>>, vector<32x1xf32>
    %21 = vector.broadcast %20 : vector<32x1xf32> to vector<32x2176xf32>
    %22 = arith.addf %19, %21 : vector<32x2176xf32>
    %23 = math.tanh %22 : vector<32x2176xf32>
    %24 = vector.extract_strided_slice %23 {offsets = [0, 0], sizes = [32, 1024], strides = [1, 1]} : vector<32x2176xf32> to vector<32x1024xf32>
    %25 = arith.mulf %24, %24 : vector<32x1024xf32>
    %cst_6 = arith.constant 1.000000e+00 : f32
    %26 = vector.broadcast %cst_6 : f32 to vector<32x1024xf32>
    %27 = arith.subf %26, %25 : vector<32x1024xf32>
    %28 = vector.extract_strided_slice %17 {offsets = [0, 0], sizes = [32, 1], strides = [1, 1]} : vector<32x8xf32> to vector<32x1xf32>
    %29 = vector.broadcast %28 : vector<32x1xf32> to vector<32x1024xf32>
    %30 = arith.mulf %27, %29 : vector<32x1024xf32>
    %c0_7 = arith.constant 0 : index
    %c0_8 = arith.constant 0 : index
    %31 = vector.load %arg5[%c0_7, %c0_8] : memref<8x32xf32, #tpu.memory_space<vmem>>, vector<8x32xf32>
    %cst_9 = arith.constant dense<0.000000e+00> : vector<8x2176xf32>
    %32 = tpu.matmul %31, %23, %cst_9 {dimension_numbers = #tpu.dot_dimension_numbers<[1], [0], [0], [1], [0, 0, 1, 1], [], []>} : vector<8x32xf32>, vector<32x2176xf32>, vector<8x2176xf32> -> vector<8x2176xf32>
    %cst_10 = arith.constant dense<0.000000e+00> : vector<8x1024xf32>
    %33 = tpu.matmul %31, %30, %cst_10 {dimension_numbers = #tpu.dot_dimension_numbers<[1], [0], [0], [1], [0, 0, 1, 1], [], []>} : vector<8x32xf32>, vector<32x1024xf32>, vector<8x1024xf32> -> vector<8x1024xf32>
    %34 = vector.extract_strided_slice %32 {offsets = [0, 0], sizes = [1, 1024], strides = [1, 1]} : vector<8x2176xf32> to vector<1x1024xf32>
    %35 = vector.broadcast %11 : f32 to vector<1x1024xf32>
    %36 = arith.addf %34, %35 : vector<1x1024xf32>
    %37 = vector.extract_strided_slice %32 {offsets = [1, 0], sizes = [1, 1024], strides = [1, 1]} : vector<8x2176xf32> to vector<1x1024xf32>
    %38 = vector.broadcast %12 : f32 to vector<1x1024xf32>
    %39 = arith.addf %37, %38 : vector<1x1024xf32>
    %40 = vector.extract_strided_slice %33 {offsets = [0, 0], sizes = [1, 1024], strides = [1, 1]} : vector<8x1024xf32> to vector<1x1024xf32>
    %41 = vector.extract_strided_slice %33 {offsets = [1, 0], sizes = [1, 1024], strides = [1, 1]} : vector<8x1024xf32> to vector<1x1024xf32>
    %42 = vector.broadcast %0 : f32 to vector<1x1024xf32>
    %43 = arith.subf %36, %42 : vector<1x1024xf32>
    %44 = vector.broadcast %1 : f32 to vector<1x1024xf32>
    %45 = arith.subf %39, %44 : vector<1x1024xf32>
    %46 = arith.mulf %43, %41 : vector<1x1024xf32>
    %47 = arith.mulf %45, %40 : vector<1x1024xf32>
    %48 = arith.subf %46, %47 : vector<1x1024xf32>
    %49 = arith.mulf %43, %43 : vector<1x1024xf32>
    %50 = arith.mulf %45, %45 : vector<1x1024xf32>
    %51 = arith.addf %49, %50 : vector<1x1024xf32>
    %52 = tpu.reciprocal %51 : vector<1x1024xf32> -> vector<1x1024xf32>
    %53 = arith.mulf %48, %52 : vector<1x1024xf32>
    %54 = vector.broadcast %2 : f32 to vector<1x1024xf32>
    %55 = arith.mulf %54, %40 : vector<1x1024xf32>
    %56 = vector.broadcast %3 : f32 to vector<1x1024xf32>
    %57 = arith.mulf %56, %41 : vector<1x1024xf32>
    %58 = vector.broadcast %4 : f32 to vector<1x1024xf32>
    %59 = arith.mulf %58, %53 : vector<1x1024xf32>
    %60 = vector.broadcast %5 : f32 to vector<1x1024xf32>
    %61 = arith.mulf %60, %36 : vector<1x1024xf32>
    %62 = vector.broadcast %6 : f32 to vector<1x1024xf32>
    %63 = arith.addf %61, %62 : vector<1x1024xf32>
    %64 = vector.broadcast %7 : f32 to vector<1x1024xf32>
    %65 = arith.mulf %64, %39 : vector<1x1024xf32>
    %66 = vector.broadcast %8 : f32 to vector<1x1024xf32>
    %67 = arith.addf %65, %66 : vector<1x1024xf32>
    %68 = arith.mulf %63, %63 : vector<1x1024xf32>
    %69 = arith.mulf %67, %67 : vector<1x1024xf32>
    %70 = arith.addf %68, %69 : vector<1x1024xf32>
    %71 = tpu.reciprocal %70 : vector<1x1024xf32> -> vector<1x1024xf32>
    %72 = vector.broadcast %9 : f32 to vector<1x1024xf32>
    %73 = arith.mulf %72, %63 : vector<1x1024xf32>
    %74 = arith.addf %55, %73 : vector<1x1024xf32>
    %75 = vector.broadcast %9 : f32 to vector<1x1024xf32>
    %76 = arith.mulf %75, %67 : vector<1x1024xf32>
    %77 = arith.addf %57, %76 : vector<1x1024xf32>
    %78 = arith.mulf %63, %71 : vector<1x1024xf32>
    %79 = arith.mulf %78, %57 : vector<1x1024xf32>
    %80 = arith.subf %59, %79 : vector<1x1024xf32>
    %81 = arith.mulf %67, %71 : vector<1x1024xf32>
    %82 = arith.mulf %81, %55 : vector<1x1024xf32>
    %83 = arith.addf %80, %82 : vector<1x1024xf32>
    %84 = vector.extract_strided_slice %32 {offsets = [0, 1024], sizes = [1, 1024], strides = [1, 1]} : vector<8x2176xf32> to vector<1x1024xf32>
    %85 = vector.broadcast %11 : f32 to vector<1x1024xf32>
    %86 = arith.addf %84, %85 : vector<1x1024xf32>
    %87 = vector.broadcast %5 : f32 to vector<1x1024xf32>
    %88 = arith.mulf %87, %86 : vector<1x1024xf32>
    %89 = vector.broadcast %6 : f32 to vector<1x1024xf32>
    %90 = arith.addf %88, %89 : vector<1x1024xf32>
    %91 = vector.extract_strided_slice %32 {offsets = [1, 1024], sizes = [1, 1024], strides = [1, 1]} : vector<8x2176xf32> to vector<1x1024xf32>
    %92 = vector.broadcast %12 : f32 to vector<1x1024xf32>
    %93 = arith.addf %91, %92 : vector<1x1024xf32>
    %94 = vector.broadcast %7 : f32 to vector<1x1024xf32>
    %95 = arith.mulf %94, %93 : vector<1x1024xf32>
    %96 = vector.broadcast %8 : f32 to vector<1x1024xf32>
    %97 = arith.addf %95, %96 : vector<1x1024xf32>
    %98 = arith.mulf %90, %90 : vector<1x1024xf32>
    %99 = arith.mulf %97, %97 : vector<1x1024xf32>
    %100 = arith.addf %98, %99 : vector<1x1024xf32>
    %101 = vector.broadcast %10 : f32 to vector<1x1024xf32>
    %102 = arith.subf %100, %101 : vector<1x1024xf32>
    %103 = vector.extract_strided_slice %32 {offsets = [0, 2048], sizes = [1, 128], strides = [1, 1]} : vector<8x2176xf32> to vector<1x128xf32>
    %104 = vector.broadcast %11 : f32 to vector<1x128xf32>
    %105 = arith.addf %103, %104 : vector<1x128xf32>
    %c0_11 = arith.constant 0 : index
    %c0_12 = arith.constant 0 : index
    %106 = vector.load %arg2[%c0_11, %c0_12] : memref<2x128xf32, #tpu.memory_space<vmem>>, vector<1x128xf32>
    %107 = arith.subf %105, %106 : vector<1x128xf32>
    %108 = vector.extract_strided_slice %32 {offsets = [1, 2048], sizes = [1, 128], strides = [1, 1]} : vector<8x2176xf32> to vector<1x128xf32>
    %109 = vector.broadcast %12 : f32 to vector<1x128xf32>
    %110 = arith.addf %108, %109 : vector<1x128xf32>
    %c1_13 = arith.constant 1 : index
    %c0_14 = arith.constant 0 : index
    %111 = vector.load %arg2[%c1_13, %c0_14] : memref<2x128xf32, #tpu.memory_space<vmem>>, vector<1x128xf32>
    %112 = arith.subf %110, %111 : vector<1x128xf32>
    %113 = arith.mulf %107, %107 : vector<1x128xf32>
    %114 = arith.mulf %112, %112 : vector<1x128xf32>
    %115 = arith.addf %113, %114 : vector<1x128xf32>
    %116 = tpu.iota {dimensions = array<i32: 1>} : vector<1x1024xi32>
    %117 = tpu.iota {dimensions = array<i32: 1>} : vector<1x128xi32>
    %118 = arith.mulf %74, %74 : vector<1x1024xf32>
    %119 = arith.mulf %77, %77 : vector<1x1024xf32>
    %120 = arith.addf %118, %119 : vector<1x1024xf32>
    %121 = vector.broadcast %14 : f32 to vector<1x1024xf32>
    %122 = arith.mulf %121, %120 : vector<1x1024xf32>
    %123 = arith.mulf %83, %83 : vector<1x1024xf32>
    %124 = vector.broadcast %15 : f32 to vector<1x1024xf32>
    %125 = arith.mulf %124, %123 : vector<1x1024xf32>
    %126 = arith.addf %122, %125 : vector<1x1024xf32>
    %127 = arith.mulf %102, %102 : vector<1x1024xf32>
    %128 = vector.broadcast %16 : f32 to vector<1x1024xf32>
    %129 = arith.mulf %128, %127 : vector<1x1024xf32>
    %130 = arith.addf %126, %129 : vector<1x1024xf32>
    %c1000_i32 = arith.constant 1000 : i32
    %131 = vector.broadcast %c1000_i32 : i32 to vector<1x1024xi32>
    %132 = arith.cmpi slt, %116, %131 : vector<1x1024xi32>
    %cst_15 = arith.constant 0.000000e+00 : f32
    %133 = vector.broadcast %cst_15 : f32 to vector<1x1024xf32>
    %134 = arith.select %132, %130, %133 : vector<1x1024xi1>, vector<1x1024xf32>
    %c16_i32 = arith.constant 16 : i32
    %135 = vector.broadcast %c16_i32 : i32 to vector<1x128xi32>
    %136 = arith.cmpi slt, %117, %135 : vector<1x128xi32>
    %cst_16 = arith.constant 0.000000e+00 : f32
    %137 = vector.broadcast %cst_16 : f32 to vector<1x128xf32>
    %138 = arith.select %136, %115, %137 : vector<1x128xi1>, vector<1x128xf32>
    %139 = vector.shape_cast %134 : vector<1x1024xf32> to vector<1x1x1024xf32>
    %cst_17 = arith.constant dense<0.000000e+00> : vector<1xf32>
    %140 = vector.multi_reduction <add>, %139, %cst_17 [1, 2] : vector<1x1x1024xf32> to vector<1xf32>
    %141 = vector.shape_cast %140 : vector<1xf32> to vector<1x1x1xf32>
    %142 = vector.extract %141[0, 0, 0] : f32 from vector<1x1x1xf32>
    %143 = vector.broadcast %142 : f32 to vector<1x1xf32>
    %144 = vector.shape_cast %138 : vector<1x128xf32> to vector<1x1x128xf32>
    %cst_18 = arith.constant dense<0.000000e+00> : vector<1xf32>
    %145 = vector.multi_reduction <add>, %144, %cst_18 [1, 2] : vector<1x1x128xf32> to vector<1xf32>
    %146 = vector.shape_cast %145 : vector<1xf32> to vector<1x1x1xf32>
    %147 = vector.extract %146[0, 0, 0] : f32 from vector<1x1x1xf32>
    %148 = vector.broadcast %147 : f32 to vector<1x1xf32>
    %149 = vector.broadcast %13 : f32 to vector<1x1xf32>
    %150 = arith.mulf %149, %148 : vector<1x1xf32>
    %151 = arith.addf %143, %150 : vector<1x1xf32>
    %c0_19 = arith.constant 0 : index
    %c0_20 = arith.constant 0 : index
    %152 = vector.load %arg6[%c0_19, %c0_20] : memref<1x1xf32, #tpu.memory_space<vmem>>, vector<1x1xf32>
    tpu.vector_store %arg6[%c0_19, %c0_20], %151 {strides = array<i32>} : memref<1x1xf32, #tpu.memory_space<vmem>>, vector<1x1xf32>,
    return
  }
}

</mosaic_0001>

<bundles_post_ra>
// kernel: _forward.1
= control target key start
LH: loop header
LB: loop body
LE: loop exit
PB: predicated region body
PF: predicated region fallthrough
CT: control target
= control target key end

     0   :  { %11 = vsyncpa [#allocation4], 0  ;;  %s4486_s0 = inlined_call_operand.vmem [shape: f32[17], index: 0, kind: input, shape index: {}]   ;;  %s4487_s1 = inlined_call_operand.vmem [shape: f32[8,2176], index: 1, kind: input, shape index: {}]   ;;  %s4488_s2 = inlined_call_operand.vmem [shape: f32[2,128], index: 2, kind: input, shape index: {}]   ;;  %s4489_s3 = inlined_call_operand.vmem [shape: f32[32,8], index: 3, kind: input, shape index: {}]   ;;  %s4490_s4 = inlined_call_operand.vmem [shape: f32[32,1], index: 4, kind: input, shape index: {}]   ;;  %s4491_s5 = inlined_call_operand.vmem [shape: f32[8,32], index: 5, kind: input, shape index: {}]   ;;  %s4492_s6 = inlined_call_operand.hbm [shape: f32[1,1], index: 6, kind: output, shape index: {}]  }
   0x1   :  { %12 = vsyncpa [#allocation3], 0  ;;  %s19_s23 = sshll.u32 %s4486_s0, 4  ;;  %s20_s23 = int_to_ptr.vmem [resolvable:$true] %s19_s23 }
   0x2   :  { %s3187_s24 = scalar_lea.vmem %s20_s23, 16  ;;  %p3192_p1 = scmp.lt.s32.totalorder %s20_s23, %s20_s23 }
   0x3   :  { %p3188_p0 = scmp.ne.s32.totalorder %s20_s23, %s3187_s24  ;;  %p3193_p2 = scmp.lt.s32.totalorder %s3187_s24, %s3187_s24 }
   0x5   :  { %p3194_p3 = por %p3193_p2, %p3192_p1 }
   0x7   :  { %p3195_p4 = pnand %p3194_p3, %p3188_p0 }
   0x9   :  { %3198 = shalt.err (!%p3195_p4)
}
   0xa   :  { %s3225_s25 = smov [#allocation2]  }
   0xb   :  { %22 = dma.vmem_to_smem %s20_s23, 16, %s3225_s25, [#allocation4]  }
   0xc   :  { %3221 = dma.done.wait [#allocation4], 16  }
   0xd   :  { %3222 = vsyncadd [#allocation4], 4294967280 }
   0xe   :  { %36 = sfence }
   0xf   :  { %v59_v0 = vld [vmem:[%s4487_s1 + $0x8] sm:$0xff]  ;;  %v61_v1 = vld [vmem:[%s4487_s1 + $0x18] sm:$0xff]  ;;  %v58_v2 = vld [vmem:[%s4487_s1] sm:$0xff]  ;;  %vm99_vm0 = vcmask 64512   ;;  %v3226_v5 = vmov 0.0   ;;  %v3227_v14 = vmov 0  }
  0x10   :  { %112 = vmatprep.subr.mxu0 %v59_v0  ;;  %201 = vmatprep.subr.mxu1 %v61_v1  ;;  %v60_v3 = vld [vmem:[%s4487_s1 + $0x10] sm:$0xff]  ;;  %v3284_v4 = vld [vmem:[%s4489_s3] sm:$0xff]  ;;  %v63_v6 = vld [vmem:[%s4487_s1 + $0x28] sm:$0xff]  ;;  %vm1090_vm1 = vcmask 261120   ;;  %vm3229_vm2 = vmmov 0   ;;  %s2811_s25 = sld [smem:[#allocation2 + $0x1]] }
  0x11   :  { %113 = vmatpush1.msra.mxu0 %v58_v2  ;;  %176 = vmatprep.mubr.f32.mxu0 %v3226_v5  ;;  %v62_v7 = vld [vmem:[%s4487_s1 + $0x20] sm:$0xff]  ;;  %v65_v8 = vld [vmem:[%s4487_s1 + $0x38] sm:$0xff]  ;;  %v67_v9 = vld [vmem:[%s4487_s1 + $0x48] sm:$0xff]  ;;  %s2815_s26 = sld [smem:[#allocation2 + $0x5]]  ;;  %s2816_s27 = sld [smem:[#allocation2 + $0x6]]  ;;  %vm2754_vm4 = vcmask 1040384  }
  0x12   :  { %202 = vmatpush1.msra.mxu1 %v60_v3  ;;  %265 = vmatprep.mubr.f32.mxu1 %v3226_v5  ;;  %v3308_v10 = vld [vmem:[%s4489_s3 + $0x8] sm:$0xff]  ;;  %v64_v11 = vld [vmem:[%s4487_s1 + $0x30] sm:$0xff]  ;;  %v69_v12 = vld [vmem:[%s4487_s1 + $0x58] sm:$0xff]  ;;  %s2817_s28 = sld [smem:[#allocation2 + $0x7]]  ;;  %s2821_s29 = sld [smem:[#allocation2 + $0xb]]  ;;  %vm2794_vm6 = vcmask 0  }
  0x13   :  { %2827 = vmatmul.mubr.msk.f32.vlgmr.msra.gmra.mrb[0].mxu0 %vm99_vm0, %v3284_v4  ;;  %2831 = vmatmul.mubr.msk.f32.vlgmr.msra.gmra.mrb[0].mxu1 %vm99_vm0, %v3284_v4  ;;  %v3325_v13 = vld [vmem:[%s4489_s3 + $0x10] sm:$0xff]  ;;  %v75_v15 = vld [vmem:[%s4490_s4] sm:$0xff]  ;;  %v3343_v17 = vld [vmem:[%s4489_s3 + $0x18] sm:$0xff]  ;;  %s2822_s0 = sld [smem:[#allocation2 + $0xc]]  ;;  %s2818_s30 = sld [smem:[#allocation2 + $0x8]] }
  0x14   :  { %290 = vmatprep.subr.mxu0 %v63_v6  ;;  %182 = vmatprep.mubr.f32.mxu0 %v3226_v5  ;;  %v77_v16 = vld [vmem:[%s4490_s4 + $0x10] sm:$0xff]  ;;  %v76_v18 = vld [vmem:[%s4490_s4 + $0x8] sm:$0xff]  ;;  %v78_v19 = vld [vmem:[%s4490_s4 + $0x18] sm:$0xff]  ;;  %s2820_s7 = sld [smem:[#allocation2 + $0xa]]  ;;  %s2826_s8 = sld [smem:[#allocation2 + $0x10]] }
  0x15   :  { %291 = vmatpush1.msra.mxu0 %v62_v7  ;;  %271 = vmatprep.mubr.f32.mxu1 %v3226_v5  ;;  %v66_v20 = vld [vmem:[%s4487_s1 + $0x40] sm:$0xff]  ;;  %v68_v21 = vld [vmem:[%s4487_s1 + $0x50] sm:$0xff]  ;;  %v71_v22 = vld [vmem:[%s4487_s1 + $0x68] sm:$0xff]  ;;  %s2819_s9 = sld [smem:[#allocation2 + $0x9]]  ;;  %s2812_s10 = sld [smem:[#allocation2 + $0x2]] }
  0x16   :  { %379 = vmatprep.subr.mxu1 %v65_v8  ;;  %468 = vmatprep.subr.mxu0 %v67_v9  ;;  %v73_v23 = vld [vmem:[%s4487_s1 + $0x78] sm:$0xff]  ;;  %v70_v24 = vld [vmem:[%s4487_s1 + $0x60] sm:$0xff]  ;;  %v72_v25 = vld [vmem:[%s4487_s1 + $0x70] sm:$0xff]  ;;  %s2813_s11 = sld [smem:[#allocation2 + $0x3]]  ;;  %s2814_s3 = sld [smem:[#allocation2 + $0x4]] }
  0x17   :  { %2828 = vmatmul.mubr.msk.f32.gmra.mrb[2].mxu0 %vm99_vm0, %v3308_v10  ;;  %2832 = vmatmul.mubr.msk.f32.gmra.mrb[2].mxu1 %vm99_vm0, %v3308_v10  ;;  %v74_v26 = vld [vmem:[%s4487_s1 + $0x80] sm:$0xff]  ;;  %s2824_s12 = sld [smem:[#allocation2 + $0xe]]  ;;  %s3938_s4 = sld [smem:[#allocation2 + $0xf]] }
  0x18   :  { %380 = vmatpush1.msra.mxu1 %v64_v11  ;;  %188 = vmatprep.mubr.f32.mxu0 %v3226_v5  ;;  %s3230_s19 = smov [#allocation5]  }
  0x19   :  { %277 = vmatprep.mubr.f32.mxu1 %v3226_v5  ;;  %557 = vmatprep.subr.mxu1 %v69_v12  ;;  %s2802_s20 = sshll.u32 %s3230_s19, 4  ;;  %s2803_s20 = int_to_ptr.vmem [resolvable:$true] %s2802_s20 }
  0x1a   :  { %3017 = vset.pattern.permute.xlu0 %v3227_v14  ;;  %3018 = vset.pattern.permute.xlu1 %v3227_v14  ;;  %s3199_s21 = scalar_lea.vmem %s2803_s20, 16  ;;  %s3203_s22 = scalar_lea.vmem %s2803_s20, 32 }
  0x1b   :  { %2829 = vmatmul.mubr.msk.f32.gmra.mrb[4].mxu0 %vm99_vm0, %v3325_v13  ;;  %2833 = vmatmul.mubr.msk.f32.gmra.mrb[4].mxu1 %vm99_vm0, %v3325_v13  ;;  %p3200_p5 = scmp.ne.s32.totalorder %s2803_s20, %s3199_s21  ;;  %p3204_p6 = scmp.lt.s32.totalorder %s2803_s20, %s2803_s20 }
  0x1c   :  { %194 = vmatprep.mubr.f32.mxu0 %v3226_v5  ;;  %283 = vmatprep.mubr.f32.mxu1 %v3226_v5  ;;  %p3205_p7 = scmp.lt.s32.totalorder %s3203_s22, %s3199_s21 }
  0x1d   :  { %81 = vperm.xlu0 %3017, %v75_v15   ;;  %91 = vperm.xlu1 %3018, %v77_v16  }
  0x1e   :  { %p3206_p8 = por %p3205_p7, %p3204_p6 }
  0x1f   :  { %2830 = vmatmul.mubr.msk.f32.gmra.mrb[6].mxu0 %vm99_vm0, %v3343_v17  ;;  %2834 = vmatmul.mubr.msk.f32.gmra.mrb[6].mxu1 %vm99_vm0, %v3343_v17 }
  0x20   :  { %354 = vmatprep.mubr.f32.mxu0 %v3226_v5  ;;  %443 = vmatprep.mubr.f32.mxu1 %v3226_v5  ;;  %p3207_p9 = pnand %p3206_p8, %p3200_p5 }
  0x21   :  { %86 = vperm.xlu0 %3017, %v76_v18   ;;  %96 = vperm.xlu1 %3018, %v78_v19  }
  0x23   :  { %2835 = vmatmul.mubr.msk.f32.vlgmr.msra.gmra.mrb[8].mxu0 %vm99_vm0, %v3284_v4  ;;  %2839 = vmatmul.mubr.msk.f32.vlgmr.msra.gmra.mrb[8].mxu1 %vm99_vm0, %v3284_v4 }
  0x24   :  { %469 = vmatpush1.msra.mxu0 %v66_v20  ;;  %360 = vmatprep.mubr.f32.mxu0 %v3226_v5 }
  0x25   :  { %449 = vmatprep.mubr.f32.mxu1 %v3226_v5  ;;  %558 = vmatpush1.msra.mxu1 %v68_v21 }
  0x26   :  { %646 = vmatprep.subr.mxu0 %v71_v22  ;;  %735 = vmatprep.subr.mxu1 %v73_v23 }
  0x27   :  { %2836 = vmatmul.mubr.msk.f32.gmra.mrb[10].mxu0 %vm99_vm0, %v3308_v10  ;;  %2840 = vmatmul.mubr.msk.f32.gmra.mrb[10].mxu1 %vm99_vm0, %v3308_v10 }
  0x28   :  { %366 = vmatprep.mubr.f32.mxu0 %v3226_v5  ;;  %455 = vmatprep.mubr.f32.mxu1 %v3226_v5 }
  0x29   :  { %1042 = vperm.xlu0 %3017, %v3284_v4   ;;  %1046 = vperm.xlu1 %3018, %v3308_v10  }
  0x2b   :  { %2837 = vmatmul.mubr.msk.f32.gmra.mrb[12].mxu0 %vm99_vm0, %v3325_v13  ;;  %2841 = vmatmul.mubr.msk.f32.gmra.mrb[12].mxu1 %vm99_vm0, %v3325_v13 }
  0x2c   :  { %372 = vmatprep.mubr.f32.mxu0 %v3226_v5  ;;  %461 = vmatprep.mubr.f32.mxu1 %v3226_v5 }
  0x2d   :  { %1050 = vperm.xlu0 %3017, %v3325_v13   ;;  %1054 = vperm.xlu1 %3018, %v3343_v17  }
  0x2f   :  { %2838 = vmatmul.mubr.msk.f32.gmra.mrb[14].mxu0 %vm99_vm0, %v3343_v17  ;;  %2842 = vmatmul.mubr.msk.f32.gmra.mrb[14].mxu1 %vm99_vm0, %v3343_v17 }
  0x30   :  { %532 = vmatprep.mubr.f32.mxu0 %v3226_v5  ;;  %621 = vmatprep.mubr.f32.mxu1 %v3226_v5 }
  0x33   :  { %2843 = vmatmul.mubr.msk.f32.vlgmr.msra.gmra.mrb[16].mxu0 %vm99_vm0, %v3284_v4  ;;  %2847 = vmatmul.mubr.msk.f32.vlgmr.msra.gmra.mrb[16].mxu1 %vm99_vm0, %v3284_v4 }
  0x34   :  { %647 = vmatpush1.msra.mxu0 %v70_v24  ;;  %538 = vmatprep.mubr.f32.mxu0 %v3226_v5 }
  0x35   :  { %627 = vmatprep.mubr.f32.mxu1 %v3226_v5  ;;  %736 = vmatpush1.msra.mxu1 %v72_v25 }
  0x36   :  { %2886 = vmatprep.subr.mxu0 %v74_v26 }
  0x37   :  { %2844 = vmatmul.mubr.msk.f32.gmra.mrb[18].mxu0 %vm99_vm0, %v3308_v10  ;;  %2848 = vmatmul.mubr.msk.f32.gmra.mrb[18].mxu1 %vm99_vm0, %v3308_v10 }
  0x38   :  { %544 = vmatprep.mubr.f32.mxu0 %v3226_v5  ;;  %633 = vmatprep.mubr.f32.mxu1 %v3226_v5 }
  0x3b   :  { %2845 = vmatmul.mubr.msk.f32.gmra.mrb[20].mxu0 %vm99_vm0, %v3325_v13  ;;  %2849 = vmatmul.mubr.msk.f32.gmra.mrb[20].mxu1 %vm99_vm0, %v3325_v13 }
  0x3c   :  { %550 = vmatprep.mubr.f32.mxu0 %v3226_v5  ;;  %639 = vmatprep.mubr.f32.mxu1 %v3226_v5 }
  0x3f   :  { %2846 = vmatmul.mubr.msk.f32.gmra.mrb[22].mxu0 %vm99_vm0, %v3343_v17  ;;  %2850 = vmatmul.mubr.msk.f32.gmra.mrb[22].mxu1 %vm99_vm0, %v3343_v17 }
  0x40   :  { %710 = vmatprep.mubr.f32.mxu0 %v3226_v5  ;;  %799 = vmatprep.mubr.f32.mxu1 %v3226_v5 }
  0x43   :  { %2851 = vmatmul.mubr.msk.f32.vlgmr.msra.gmra.mrb[24].mxu0 %vm99_vm0, %v3284_v4  ;;  %2855 = vmatmul.mubr.msk.f32.vlgmr.msra.gmra.mrb[24].mxu1 %vm99_vm0, %v3284_v4 }
  0x44   :  { %2887 = vmatpush3.msra.mxu0 %v74_v26  ;;  %716 = vmatprep.mubr.f32.mxu0 %v3226_v5 }
  0x45   :  { %805 = vmatprep.mubr.f32.mxu1 %v3226_v5 }
  0x47   :  { %2852 = vmatmul.mubr.msk.f32.gmra.mrb[26].mxu0 %vm99_vm0, %v3308_v10  ;;  %2856 = vmatmul.mubr.msk.f32.gmra.mrb[26].mxu1 %vm99_vm0, %v3308_v10 }
  0x48   :  { %722 = vmatprep.mubr.f32.mxu0 %v3226_v5  ;;  %811 = vmatprep.mubr.f32.mxu1 %v3226_v5 }
  0x4b   :  { %2853 = vmatmul.mubr.msk.f32.gmra.mrb[28].mxu0 %vm99_vm0, %v3325_v13  ;;  %2857 = vmatmul.mubr.msk.f32.gmra.mrb[28].mxu1 %vm99_vm0, %v3325_v13 }
  0x4c   :  { %728 = vmatprep.mubr.f32.mxu0 %v3226_v5  ;;  %817 = vmatprep.mubr.f32.mxu1 %v3226_v5 }
  0x4f   :  { %2854 = vmatmul.mubr.msk.f32.gmra.mrb[30].mxu0 %vm99_vm0, %v3343_v17  ;;  %2858 = vmatmul.mubr.msk.f32.gmra.mrb[30].mxu1 %vm99_vm0, %v3343_v17 }
  0x50   :  { %2888 = vmatprep.mubr.msk.f32.mxu0 %vm99_vm0, %v3284_v4  ;;  %1158 = vmatprep.mubr.f32.mxu1 %v3226_v5 }
  0x53   :  { %2889 = vmatmul.mubr.msk.f32.vlgmr.msra.gmra.mrb[32].mxu0 %vm99_vm0, %v3308_v10 }
  0x54   :  { %2891 = vmatprep.mubr.msk.f32.mxu0 %vm99_vm0, %v3325_v13 }
  0x57   :  { %2892 = vmatmul.mubr.msk.f32.gmra.mrb[34].mxu0 %vm99_vm0, %v3343_v17 }
  0x58   :  { %1229 = vmatprep.mubr.f32.mxu0 %v3226_v5 }
  0x9c   :  { %v3462_v27 = vpop.permute.xlu0 %81  ;;  %v3470_v37 = vpop.permute.xlu1 %91 }
  0xa0   :  { %v3468_v36 = vpop.permute.xlu0 %86  ;;  %v3480_v54 = vpop.permute.xlu1 %96 }
  0xa8   :  { %v3486_v3 = vpop.permute.xlu0 %1042  ;;  %v3496_v22 = vpop.permute.xlu1 %1046 }
  0xe6   :  { %v178_v28 = vpop.f32.mrb[0].mxu0  ;;  %v267_v29 = vpop.f32.mrb[0].mxu1 }
  0xe7   :  { %v179_v30 = vadd.f32 %v178_v28, %v3462_v27  ;;  %v180_v31 = vpop.f32.mrb[1].mxu0  ;;  %v268_v32 = vadd.f32 %v267_v29, %v3462_v27  ;;  %v269_v33 = vpop.f32.mrb[1].mxu1 }
  0xe8   :  { %v181_v34 = vadd.f32 %v180_v31, %v3462_v27  ;;  %v270_v35 = vadd.f32 %v269_v33, %v3462_v27 }
  0xe9   :  { %3019 = vtanh.f32 %v179_v30 }
  0xea   :  { %3021 = vtanh.f32 %v181_v34  ;;  %v184_v38 = vpop.f32.mrb[2].mxu0  ;;  %v273_v39 = vpop.f32.mrb[2].mxu1 }
  0xeb   :  { %3023 = vtanh.f32 %v268_v32  ;;  %v185_v40 = vadd.f32 %v184_v38, %v3468_v36  ;;  %v274_v41 = vadd.f32 %v273_v39, %v3468_v36  ;;  %v186_v42 = vpop.f32.mrb[3].mxu0  ;;  %v275_v43 = vpop.f32.mrb[3].mxu1 }
  0xec   :  { %3025 = vtanh.f32 %v270_v35  ;;  %v187_v44 = vadd.f32 %v186_v42, %v3468_v36  ;;  %v276_v45 = vadd.f32 %v275_v43, %v3468_v36 }
  0xed   :  { %3027 = vtanh.f32 %v185_v40 }
  0xee   :  { %3029 = vtanh.f32 %v274_v41  ;;  %v190_v46 = vpop.f32.mrb[4].mxu0  ;;  %v279_v47 = vpop.f32.mrb[4].mxu1 }
  0xef   :  { %3031 = vtanh.f32 %v187_v44  ;;  %v191_v48 = vadd.f32 %v190_v46, %v3470_v37  ;;  %v280_v49 = vadd.f32 %v279_v47, %v3470_v37  ;;  %v192_v50 = vpop.f32.mrb[5].mxu0  ;;  %v281_v51 = vpop.f32.mrb[5].mxu1 }
  0xf0   :  { %3033 = vtanh.f32 %v276_v45  ;;  %v193_v52 = vadd.f32 %v192_v50, %v3470_v37  ;;  %v282_v53 = vadd.f32 %v281_v51, %v3470_v37 }
  0xf1   :  { %3035 = vtanh.f32 %v191_v48 }
  0xf2   :  { %3037 = vtanh.f32 %v280_v49  ;;  %v196_v55 = vpop.f32.mrb[6].mxu0  ;;  %v285_v56 = vpop.f32.mrb[6].mxu1 }
  0xf3   :  { %v3020_v57 = vpop.eup %3019  ;;  %3039 = vtanh.f32 %v193_v52  ;;  %v197_v58 = vadd.f32 %v196_v55, %v3480_v54  ;;  %v286_v59 = vadd.f32 %v285_v56, %v3480_v54  ;;  %v198_v60 = vpop.f32.mrb[7].mxu0 }
  0xf4   :  { %v287_v61 = vpop.f32.mrb[7].mxu1  ;;  %v3022_v62 = vpop.eup %3021  ;;  %3041 = vtanh.f32 %v282_v53  ;;  %v199_v63 = vadd.f32 %v198_v60, %v3480_v54  ;;  %v977_v1 = vmul.f32 %v3020_v57, %v3020_v57 }
  0xf5   :  { %v288_v0 = vadd.f32 %v287_v61, %v3480_v54  ;;  %v3024_v2 = vpop.eup %3023  ;;  %3043 = vtanh.f32 %v197_v58  ;;  %v978_v4 = vmul.f32 %v3022_v62, %v3022_v62 }
  0xf6   :  { %v3026_v6 = vpop.eup %3025  ;;  %3045 = vtanh.f32 %v286_v59  ;;  %v356_v7 = vpop.f32.mrb[8].mxu0  ;;  %v1009_v9 = vsub.f32 1.0, %v977_v1  ;;  %v3488_v10 = vmul.f32 %v3024_v2, %v3024_v2 }
  0xf7   :  { %v445_v8 = vpop.f32.mrb[8].mxu1  ;;  %v3028_v11 = vpop.eup %3027  ;;  %3047 = vtanh.f32 %v199_v63  ;;  %v357_v12 = vadd.f32 %v356_v7, %v3462_v27  ;;  %v1010_v16 = vsub.f32 1.0, %v978_v4  ;;  %v3517_v48 = vmul.f32 %v3026_v6, %v3026_v6 }
  0xf8   :  { %v446_v13 = vadd.f32 %v445_v8, %v3462_v27  ;;  %v358_v14 = vpop.f32.mrb[9].mxu0  ;;  %v447_v15 = vpop.f32.mrb[9].mxu1  ;;  %3049 = vtanh.f32 %v288_v0  ;;  %v2907_v20 = vpack.c.bf16 %v3028_v11, %v3020_v57  ;;  %v985_v25 = vmul.f32 %v3028_v11, %v3028_v11 }
  0xf9   :  { %v3492_v17 = vpop.eup %3029  ;;  %v359_v18 = vadd.f32 %v358_v14, %v3462_v27  ;;  %v448_v19 = vadd.f32 %v447_v15, %v3462_v27  ;;  %3051 = vtanh.f32 %v357_v12  ;;  %v3500_v24 = vmul.f32 %v3486_v3, %v1010_v16  ;;  %v3536_v4 = vpop.permute.xlu0 %1050 }
  0xfa   :  { %v3032_v21 = vpop.eup %3031  ;;  %v2915_v23 = vpack.c.bf16 %v3492_v17, %v3024_v2  ;;  %3053 = vtanh.f32 %v446_v13  ;;  %v362_v28 = vpop.f32.mrb[10].mxu0  ;;  %v3503_v32 = vmul.f32 %v3486_v3, %v1009_v9  ;;  %v1017_v46 = vsub.f32 1.0, %v985_v25 }
  0xfb   :  { %v3034_v26 = vpop.eup %3033  ;;  %v451_v29 = vpop.f32.mrb[10].mxu1  ;;  %v2905_v30 = vpack.c.bf16 %v3032_v21, %v3022_v62  ;;  %v986_v31 = vmul.f32 %v3032_v21, %v3032_v21  ;;  %3055 = vtanh.f32 %v359_v18  ;;  %v363_v34 = vadd.f32 %v362_v28, %v3468_v36 }
  0xfc   :  { %v3505_v33 = vpop.eup %3035  ;;  %v452_v35 = vadd.f32 %v451_v29, %v3468_v36  ;;  %v364_v38 = vpop.f32.mrb[11].mxu0  ;;  %v2913_v40 = vpack.c.bf16 %v3034_v26, %v3026_v6  ;;  %3057 = vtanh.f32 %v448_v19  ;;  %v3524_v55 = vmul.f32 %v3034_v26, %v3034_v26 }
  0xfd   :  { %v453_v39 = vpop.f32.mrb[11].mxu1  ;;  %v3509_v41 = vpop.eup %3037  ;;  %v365_v42 = vadd.f32 %v364_v38, %v3468_v36  ;;  %2906 = vmatprep.subr.bf16.mxu1 %v2905_v30  ;;  %v1018_v44 = vsub.f32 1.0, %v986_v31  ;;  %3059 = vtanh.f32 %v363_v34  ;;  %v3515_v47 = vmul.f32 %v3505_v33, %v3505_v33 }
  0xfe   :  { %v454_v43 = vadd.f32 %v453_v39, %v3468_v36  ;;  %v3040_v45 = vpop.eup %3039  ;;  %2914 = vmatprep.subr.bf16.mxu0 %v2913_v40  ;;  %2908 = vmatpush1.bf16.msra.mxu1 %v2907_v20  ;;  %3061 = vtanh.f32 %v452_v35  ;;  %v368_v50 = vpop.f32.mrb[12].mxu0  ;;  %v3529_v61 = vmul.f32 %v3496_v22, %v1017_v46 }
  0xff   :  { %v3519_v49 = vpop.eup %3041  ;;  %2916 = vmatpush1.bf16.msra.mxu0 %v2915_v23  ;;  %v457_v51 = vpop.f32.mrb[12].mxu1  ;;  %v3522_v52 = vmul.f32 %v3496_v22, %v1018_v44  ;;  %v994_v53 = vmul.f32 %v3040_v45, %v3040_v45  ;;  %3063 = vtanh.f32 %v365_v42  ;;  %v369_v57 = vadd.f32 %v368_v50, %v3470_v37 }
 0x100   :  { %v3044_v56 = vpop.eup %3043  ;;  %v458_v58 = vadd.f32 %v457_v51, %v3470_v37  ;;  %v370_v59 = vpop.f32.mrb[13].mxu0  ;;  %3065 = vtanh.f32 %v454_v43  ;;  %v1025_v38 = vsub.f32 1.0, %v3515_v47  ;;  %v1012_v44 = vsub.f32 1.0, %v3517_v48 }
 0x101   :  { %v459_v60 = vpop.f32.mrb[13].mxu1  ;;  %v3531_v62 = vpop.eup %3045  ;;  %v371_v63 = vadd.f32 %v370_v59, %v3470_v37  ;;  %v2911_v1 = vpack.c.bf16 %v3044_v56, %v3505_v33  ;;  %3067 = vtanh.f32 %v369_v57  ;;  %v1026_v16 = vsub.f32 1.0, %v994_v53  ;;  %v3561_v33 = vld [vmem:[%s4491_s5] sm:$0xff]  ;;  %s37_s5 = sld [smem:[#allocation2]] }
 0x102   :  { %v460_v0 = vadd.f32 %v459_v60, %v3470_v37  ;;  %v3048_v2 = vpop.eup %3047  ;;  %v3538_v6 = vpop.permute.xlu1 %1054  ;;  %v2919_v7 = vpack.c.bf16 %v3531_v62, %v3509_v41  ;;  %3069 = vtanh.f32 %v458_v58  ;;  %v1001_v35 = vmul.f32 %v3044_v56, %v3044_v56 }
 0x103   :  { %v3546_v11 = vpop.eup %3049  ;;  %v374_v12 = vpop.f32.mrb[14].mxu0  ;;  %v2909_v14 = vpack.c.bf16 %v3048_v2, %v3040_v45  ;;  %v1002_v15 = vmul.f32 %v3048_v2, %v3048_v2  ;;  %3071 = vtanh.f32 %v371_v63  ;;  %v3564_v34 = vmul.f32 %v3536_v4, %v1026_v16 }
 0x104   :  { %v463_v13 = vpop.f32.mrb[14].mxu1  ;;  %v3548_v18 = vpop.eup %3051  ;;  %v375_v19 = vadd.f32 %v374_v12, %v3480_v54  ;;  %v2917_v25 = vpack.c.bf16 %v3546_v11, %v3519_v49  ;;  %3073 = vtanh.f32 %v460_v0  ;;  %v1020_v45 = vsub.f32 1.0, %v3524_v55 }
 0x105   :  { %v464_v20 = vadd.f32 %v463_v13, %v3480_v54  ;;  %v376_v21 = vpop.f32.mrb[15].mxu0  ;;  %v465_v23 = vpop.f32.mrb[15].mxu1  ;;  %2910 = vmatprep.subr.bf16.mxu1 %v2909_v14  ;;  %v1034_v30 = vsub.f32 1.0, %v1002_v15  ;;  %v1033_v56 = vsub.f32 1.0, %v1001_v35  ;;  %v3594_v0 = vmul.f32 %v3536_v4, %v1025_v38 }
 0x106   :  { %v3554_v26 = vpop.eup %3053  ;;  %v377_v28 = vadd.f32 %v376_v21, %v3480_v54  ;;  %v466_v29 = vadd.f32 %v465_v23, %v3480_v54  ;;  %3075 = vtanh.f32 %v375_v19  ;;  %2918 = vmatprep.subr.bf16.mxu0 %v2917_v25  ;;  %2912 = vmatpush1.bf16.msra.mxu1 %v2911_v1  ;;  %v534_v40 = vpop.f32.mrb[16].mxu0  ;;  %v3603_v14 = vmul.f32 %v3486_v3, %v1012_v44 }
 0x107   :  { %v3056_v31 = vpop.eup %3055  ;;  %3077 = vtanh.f32 %v464_v20  ;;  %2920 = vmatpush1.bf16.msra.mxu0 %v2919_v7  ;;  %v623_v42 = vpop.f32.mrb[16].mxu1  ;;  %v3570_v43 = vmul.f32 %v3538_v6, %v1034_v30  ;;  %v535_v50 = vadd.f32 %v534_v40, %v3462_v27  ;;  %v3600_v13 = vmul.f32 %v3538_v6, %v1033_v56 }
 0x108   :  { %v3567_v39 = vpop.eup %3057  ;;  %3079 = vtanh.f32 %v377_v28  ;;  %v624_v47 = vadd.f32 %v623_v42, %v3462_v27  ;;  %v536_v51 = vpop.f32.mrb[17].mxu0  ;;  %v3620_v38 = vmul.f32 %v3496_v22, %v1020_v45  ;;  %v982_v40 = vmul.f32 %v3056_v31, %v3056_v31 }
 0x109   :  { %v3574_v46 = vpop.eup %3059  ;;  %v625_v53 = vpop.f32.mrb[17].mxu1  ;;  %3081 = vtanh.f32 %v466_v29  ;;  %v537_v58 = vadd.f32 %v536_v51, %v3462_v27  ;;  %2863 = vmatmul.mubr.msk.f32.vlgmr.msra.gmra.mrb[32].mxu1 %vm1090_vm1, %v3561_v33  ;;  %v987_v51 = vmul.f32 %v3492_v17, %v3492_v17  ;;  %v3629_v56 = vmul.f32 %v3548_v18, %v3548_v18 }
 0x10a   :  { %v3578_v57 = vpop.eup %3061  ;;  %v626_v59 = vadd.f32 %v625_v53, %v3462_v27  ;;  %v2923_v48 = vpack.c.bf16 %v3574_v46, %v3548_v18  ;;  %3083 = vtanh.f32 %v535_v50  ;;  %2864 = vmatmul.mubr.msk.f32.vlgmr.msra.gmra.mrb[36].mxu0 %vm1090_vm1, %v3561_v33  ;;  %1300 = vmatprep.mubr.f32.mxu1 %v3226_v5  ;;  %v540_v2 = vpop.f32.mrb[18].mxu0  ;;  %v1011_v53 = vsub.f32 1.0, %v3488_v10 }
 0x10b   :  { %v3064_v55 = vpop.eup %3063  ;;  %v2931_v60 = vpack.c.bf16 %v3578_v57, %v3554_v26  ;;  %3085 = vtanh.f32 %v624_v47  ;;  %v629_v7 = vpop.f32.mrb[18].mxu1  ;;  %1371 = vmatprep.mubr.f32.mxu0 %v3226_v5  ;;  %v541_v16 = vadd.f32 %v540_v2, %v3468_v36 }
 0x10c   :  { %v3596_v1 = vpop.eup %3065  ;;  %v2921_v12 = vpack.c.bf16 %v3064_v55, %v3056_v31  ;;  %3087 = vtanh.f32 %v537_v58  ;;  %v630_v19 = vadd.f32 %v629_v7, %v3468_v36  ;;  %v542_v20 = vpop.f32.mrb[19].mxu0  ;;  %v990_v42 = vmul.f32 %v3064_v55, %v3064_v55 }
 0x10d   :  { %v3605_v15 = vpop.eup %3067  ;;  %v631_v21 = vpop.f32.mrb[19].mxu1  ;;  %v2929_v23 = vpack.c.bf16 %v3596_v1, %v3567_v39  ;;  %3089 = vtanh.f32 %v626_v59  ;;  %v543_v28 = vadd.f32 %v542_v20, %v3468_v36 }
 0x10e   :  { %v3611_v25 = vpop.eup %3069  ;;  %v632_v29 = vadd.f32 %v631_v21, %v3468_v36  ;;  %2922 = vmatprep.subr.bf16.mxu1 %v2921_v12  ;;  %3091 = vtanh.f32 %v541_v16  ;;  %v546_v50 = vpop.f32.mrb[20].mxu0  ;;  %v1014_v12 = vsub.f32 1.0, %v982_v40  ;;  %v1022_v16 = vsub.f32 1.0, %v990_v42 }
 0x10f   :  { %v3617_v35 = vpop.eup %3071  ;;  %2930 = vmatprep.subr.bf16.mxu0 %v2929_v23  ;;  %2924 = vmatpush1.bf16.msra.mxu1 %v2923_v48  ;;  %3093 = vtanh.f32 %v630_v19  ;;  %v635_v47 = vpop.f32.mrb[20].mxu1  ;;  %v547_v31 = vadd.f32 %v546_v50, %v3470_v37 }
 0x110   :  { %v3622_v44 = vpop.eup %3073  ;;  %2932 = vmatpush1.bf16.msra.mxu0 %v2931_v60  ;;  %3095 = vtanh.f32 %v543_v28  ;;  %v636_v45 = vadd.f32 %v635_v47, %v3470_v37  ;;  %v548_v59 = vpop.f32.mrb[21].mxu0  ;;  %v1019_v28 = vsub.f32 1.0, %v987_v51 }
 0x111   :  { %v3631_v58 = vpop.eup %3075  ;;  %v637_v48 = vpop.f32.mrb[21].mxu1  ;;  %3097 = vtanh.f32 %v632_v29  ;;  %v549_v10 = vadd.f32 %v548_v59, %v3470_v37  ;;  %v3652_v29 = vmul.f32 %v3486_v3, %v1011_v53 }
 0x112   :  { %v3637_v60 = vpop.eup %3077  ;;  %v638_v17 = vadd.f32 %v637_v48, %v3470_v37  ;;  %v2927_v18 = vpack.c.bf16 %v3631_v58, %v3605_v15  ;;  %3099 = vtanh.f32 %v547_v31  ;;  %v552_v20 = vpop.f32.mrb[22].mxu0  ;;  %v3665_v48 = vmul.f32 %v3486_v3, %v1014_v12 }
 0x113   :  { %v3643_v2 = vpop.eup %3079  ;;  %v2935_v7 = vpack.c.bf16 %v3637_v60, %v3611_v25  ;;  %3101 = vtanh.f32 %v636_v45  ;;  %v641_v21 = vpop.f32.mrb[22].mxu1  ;;  %v553_v47 = vadd.f32 %v552_v20, %v3480_v54  ;;  %v3668_v20 = vmul.f32 %v3496_v22, %v1022_v16 }
 0x114   :  { %v3647_v19 = vpop.eup %3081  ;;  %v2925_v23 = vpack.c.bf16 %v3643_v2, %v3617_v35  ;;  %3103 = vtanh.f32 %v549_v10  ;;  %v642_v40 = vadd.f32 %v641_v21, %v3480_v54  ;;  %v554_v42 = vpop.f32.mrb[23].mxu0  ;;  %v3671_v21 = vmul.f32 %v3496_v22, %v1019_v28 }
 0x115   :  { %v3654_v50 = vpop.eup %3083  ;;  %v643_v31 = vpop.f32.mrb[23].mxu1  ;;  %v2933_v45 = vpack.c.bf16 %v3647_v19, %v3622_v44  ;;  %3105 = vtanh.f32 %v638_v17  ;;  %v555_v51 = vadd.f32 %v554_v42, %v3480_v54  ;;  %v989_v17 = vmul.f32 %v3574_v46, %v3574_v46 }
 0x116   :  { %v3660_v59 = vpop.eup %3085  ;;  %v644_v53 = vadd.f32 %v643_v31, %v3480_v54  ;;  %2926 = vmatprep.subr.bf16.mxu1 %v2925_v23  ;;  %3107 = vtanh.f32 %v553_v47  ;;  %v712_v23 = vpop.f32.mrb[24].mxu0  ;;  %v1013_v12 = vsub.f32 1.0, %v3629_v56  ;;  %v996_v47 = vmul.f32 %v3519_v49, %v3519_v49 }
 0x117   :  { %v3088_v10 = vpop.eup %3087  ;;  %2934 = vmatprep.subr.bf16.mxu0 %v2933_v45  ;;  %2928 = vmatpush1.bf16.msra.mxu1 %v2927_v18  ;;  %3109 = vtanh.f32 %v642_v40  ;;  %v801_v31 = vpop.f32.mrb[24].mxu1  ;;  %v3680_v18 = vmul.f32 %v3546_v11, %v3546_v11  ;;  %v713_v28 = vadd.f32 %v712_v23, %v3462_v27 }
 0x118   :  { %v3090_v42 = vpop.eup %3089  ;;  %2936 = vmatpush1.bf16.msra.mxu0 %v2935_v7  ;;  %3111 = vtanh.f32 %v555_v51  ;;  %v802_v46 = vadd.f32 %v801_v31, %v3462_v27  ;;  %v714_v45 = vpop.f32.mrb[25].mxu0  ;;  %v1021_v31 = vsub.f32 1.0, %v989_v17 }
 0x119   :  { %v3092_v16 = vpop.eup %3091  ;;  %v803_v40 = vpop.f32.mrb[25].mxu1  ;;  %3113 = vtanh.f32 %v644_v53  ;;  %v715_v56 = vadd.f32 %v714_v45, %v3462_v27 }
 0x11a   :  { %v3094_v55 = vpop.eup %3093  ;;  %v804_v49 = vadd.f32 %v803_v40, %v3462_v27  ;;  %2865 = vmatmul.mubr.msk.f32.vlgmr.msra.gmra.mrb[34].mxu1 %vm1090_vm1, %v3561_v33  ;;  %v2939_v11 = vpack.c.bf16 %v3092_v16, %v3654_v50  ;;  %3115 = vtanh.f32 %v713_v28  ;;  %v718_v40 = vpop.f32.mrb[26].mxu0  ;;  %v3699_v50 = vmul.f32 %v3486_v3, %v1013_v12 }
 0x11b   :  { %v3096_v51 = vpop.eup %3095  ;;  %2866 = vmatmul.mubr.msk.f32.vlgmr.msra.gmra.mrb[38].mxu0 %vm1090_vm1, %v3561_v33  ;;  %v2947_v23 = vpack.c.bf16 %v3094_v55, %v3660_v59  ;;  %1442 = vmatprep.mubr.f32.mxu1 %v3226_v5  ;;  %3117 = vtanh.f32 %v802_v46  ;;  %v807_v7 = vpop.f32.mrb[26].mxu1  ;;  %v1028_v16 = vsub.f32 1.0, %v996_v47  ;;  %v719_v55 = vadd.f32 %v718_v40, %v3468_v36 }
 0x11c   :  { %v3098_v45 = vpop.eup %3097  ;;  %v2937_v30 = vpack.c.bf16 %v3096_v51, %v3088_v10  ;;  %1513 = vmatprep.mubr.f32.mxu0 %v3226_v5  ;;  %3119 = vtanh.f32 %v715_v56  ;;  %v808_v59 = vadd.f32 %v807_v7, %v3468_v36  ;;  %v720_v53 = vpop.f32.mrb[27].mxu0  ;;  %v3710_v12 = vmul.f32 %v3496_v22, %v1021_v31 }
 0x11d   :  { %v3701_v28 = vpop.eup %3099  ;;  %v809_v17 = vpop.f32.mrb[27].mxu1  ;;  %v2945_v63 = vpack.c.bf16 %v3098_v45, %v3090_v42  ;;  %3121 = vtanh.f32 %v804_v49  ;;  %v721_v10 = vadd.f32 %v720_v53, %v3468_v36  ;;  %v1036_v7 = vsub.f32 1.0, %v3680_v18 }
 0x11e   :  { %v3705_v46 = vpop.eup %3101  ;;  %v810_v51 = vadd.f32 %v809_v17, %v3468_v36  ;;  %2938 = vmatprep.subr.bf16.mxu1 %v2937_v30  ;;  %3123 = vtanh.f32 %v719_v55  ;;  %v3714_v56 = vmul.f32 %v3536_v4, %v1028_v16  ;;  %v998_v42 = vmul.f32 %v3617_v35, %v3617_v35  ;;  %v724_v53 = vpop.f32.mrb[28].mxu0 }
 0x11f   :  { %v3104_v47 = vpop.eup %3103  ;;  %2946 = vmatprep.subr.bf16.mxu0 %v2945_v63  ;;  %2940 = vmatpush1.bf16.msra.mxu1 %v2939_v11  ;;  %3125 = vtanh.f32 %v808_v59  ;;  %v813_v30 = vpop.f32.mrb[28].mxu1  ;;  %v1006_v63 = vmul.f32 %v3643_v2, %v3643_v2  ;;  %v995_v18 = vmul.f32 %v3509_v41, %v3509_v41  ;;  %v725_v45 = vadd.f32 %v724_v53, %v3470_v37 }
 0x120   :  { %v3106_v49 = vpop.eup %3105  ;;  %2948 = vmatpush1.bf16.msra.mxu0 %v2947_v23  ;;  %3127 = vtanh.f32 %v721_v10  ;;  %v814_v35 = vadd.f32 %v813_v30, %v3470_v37  ;;  %v726_v40 = vpop.f32.mrb[29].mxu0  ;;  %v3727_v23 = vmul.f32 %v3538_v6, %v1036_v7  ;;  %v1030_v30 = vsub.f32 1.0, %v998_v42 }
 0x121   :  { %v3108_v11 = vpop.eup %3107  ;;  %v815_v16 = vpop.f32.mrb[29].mxu1  ;;  %3129 = vtanh.f32 %v810_v51  ;;  %v727_v59 = vadd.f32 %v726_v40, %v3470_v37  ;;  %v1038_v51 = vsub.f32 1.0, %v1006_v63  ;;  %v1003_v40 = vmul.f32 %v3531_v62, %v3531_v62 }
 0x122   :  { %v3110_v55 = vpop.eup %3109  ;;  %v816_v2 = vadd.f32 %v815_v16, %v3470_v37  ;;  %v2943_v17 = vpack.c.bf16 %v3108_v11, %v3701_v28  ;;  %3131 = vtanh.f32 %v725_v45  ;;  %v2987_v53 = vpack.c.bf16 %v3727_v23, %v3714_v56  ;;  %v730_v7 = vpop.f32.mrb[30].mxu0 }
 0x123   :  { %v3112_v41 = vpop.eup %3111  ;;  %v2951_v10 = vpack.c.bf16 %v3110_v55, %v3705_v46  ;;  %3133 = vtanh.f32 %v814_v35  ;;  %v819_v9 = vpop.f32.mrb[30].mxu1  ;;  %v731_v28 = vadd.f32 %v730_v7, %v3480_v54  ;;  %v3746_v62 = vmul.f32 %v3536_v4, %v1030_v30 }
 0x124   :  { %v3114_v31 = vpop.eup %3113  ;;  %v2941_v8 = vpack.c.bf16 %v3112_v41, %v3104_v47  ;;  %3135 = vtanh.f32 %v727_v59  ;;  %v820_v46 = vadd.f32 %v819_v9, %v3480_v54  ;;  %v732_v11 = vpop.f32.mrb[31].mxu0  ;;  %v3749_v9 = vmul.f32 %v3538_v6, %v1038_v51 }
 0x125   :  { %v3737_v16 = vpop.eup %3115  ;;  %v821_v45 = vpop.f32.mrb[31].mxu1  ;;  %v2949_v55 = vpack.c.bf16 %v3114_v31, %v3106_v49  ;;  %3137 = vtanh.f32 %v816_v2  ;;  %v733_v35 = vadd.f32 %v732_v11, %v3480_v54  ;;  %v1027_v59 = vsub.f32 1.0, %v995_v18 }
 0x126   :  { %v3741_v42 = vpop.eup %3117  ;;  %v822_v47 = vadd.f32 %v821_v45, %v3480_v54  ;;  %2942 = vmatprep.subr.bf16.mxu1 %v2941_v8  ;;  %3139 = vtanh.f32 %v731_v28  ;;  %v1035_v49 = vsub.f32 1.0, %v1003_v40  ;;  %v2890_v2 = vpop.f32.mrb[32].mxu0  ;;  %v997_v41 = vmul.f32 %v3605_v15, %v3605_v15 }
 0x127   :  { %v3120_v63 = vpop.eup %3119  ;;  %2950 = vmatprep.subr.bf16.mxu0 %v2949_v55  ;;  %2944 = vmatpush1.bf16.msra.mxu1 %v2943_v17  ;;  %3141 = vtanh.f32 %v820_v46  ;;  %v1005_v8 = vmul.f32 %v3631_v58, %v3631_v58  ;;  %v984_v30 = vmul.f32 %v3567_v39, %v3567_v39  ;;  %v896_v17 = vadd.f32 %v2890_v2, %v3468_v36  ;;  %v890_v51 = vpop.f32.mrb[33].mxu0 }
 0x128   :  { %v3122_v31 = vpop.eup %3121  ;;  %2952 = vmatpush1.bf16.msra.mxu0 %v2951_v10  ;;  %3143 = vtanh.f32 %v733_v35  ;;  %v2995_v18 = vpack.c.bf16 %v3749_v9, %v3746_v62  ;;  %v3761_v10 = vmul.f32 %v3536_v4, %v1027_v59  ;;  %v891_v15 = vadd.f32 %v890_v51, %v3462_v27 }
 0x129   :  { %v3124_v7 = vpop.eup %3123  ;;  %3145 = vtanh.f32 %v822_v47  ;;  %v3768_v58 = vmul.f32 %v3538_v6, %v1035_v49  ;;  %v1029_v46 = vsub.f32 1.0, %v997_v41  ;;  %v1037_v11 = vsub.f32 1.0, %v1005_v8 }
 0x12a   :  { %v3126_v40 = vpop.eup %3125  ;;  %2867 = vmatmul.mubr.msk.f32.vlgmr.msra.gmra.mrb[36].mxu1 %vm1090_vm1, %v3561_v33  ;;  %v2955_v39 = vpack.c.bf16 %v3124_v7, %v3737_v16  ;;  %3147 = vtanh.f32 %v896_v17  ;;  %v2893_v45 = vpop.f32.mrb[34].mxu0  ;;  %v992_v35 = vmul.f32 %v3596_v1, %v3596_v1  ;;  %v1016_v7 = vsub.f32 1.0, %v984_v30 }
 0x12b   :  { %v3128_v36 = vpop.eup %3127  ;;  %2868 = vmatmul.mubr.msk.f32.vlgmr.msra.gmra.mrb[40].mxu0 %vm1090_vm1, %v3561_v33  ;;  %v2963_v28 = vpack.c.bf16 %v3126_v40, %v3741_v42  ;;  %1584 = vmatprep.mubr.f32.mxu1 %v3226_v5  ;;  %3149 = vtanh.f32 %v891_v15  ;;  %v2989_v16 = vpack.c.bf16 %v3768_v58, %v3761_v10  ;;  %v906_v59 = vadd.f32 %v2893_v45, %v3480_v54  ;;  %v900_v42 = vpop.f32.mrb[35].mxu0 }
 0x12c   :  { %v3130_v27 = vpop.eup %3129  ;;  %v2953_v55 = vpack.c.bf16 %v3128_v36, %v3120_v63  ;;  %1655 = vmatprep.mubr.f32.mxu0 %v3226_v5  ;;  %v3781_v2 = vmul.f32 %v3536_v4, %v1029_v46  ;;  %v3784_v41 = vmul.f32 %v3538_v6, %v1037_v11  ;;  %v901_v8 = vadd.f32 %v900_v42, %v3470_v37 }
 0x12d   :  { %v3132_v47 = vpop.eup %3131  ;;  %v2961_v49 = vpack.c.bf16 %v3130_v27, %v3122_v31  ;;  %v1024_v17 = vsub.f32 1.0, %v992_v35  ;;  %v983_v1 = vmul.f32 %v3554_v26, %v3554_v26  ;;  %3151 = vtanh.f32 %v906_v59 }
 0x12e   :  { %v3134_v63 = vpop.eup %3133  ;;  %2954 = vmatprep.subr.bf16.mxu1 %v2953_v55  ;;  %v2997_v54 = vpack.c.bf16 %v3784_v41, %v3781_v2  ;;  %v991_v31 = vmul.f32 %v3578_v57, %v3578_v57  ;;  %v1000_v40 = vmul.f32 %v3622_v44, %v3622_v44  ;;  %3153 = vtanh.f32 %v901_v8 }
 0x12f   :  { %v3136_v51 = vpop.eup %3135  ;;  %2962 = vmatprep.subr.bf16.mxu0 %v2961_v49  ;;  %2956 = vmatpush1.bf16.msra.mxu1 %v2955_v39  ;;  %v3796_v30 = vmul.f32 %v3486_v3, %v1016_v7  ;;  %v3799_v26 = vmul.f32 %v3496_v22, %v1024_v17  ;;  %v1015_v15 = vsub.f32 1.0, %v983_v1  ;;  %v1008_v46 = vmul.f32 %v3647_v19, %v3647_v19 }
 0x130   :  { %v3138_v37 = vpop.eup %3137  ;;  %2964 = vmatpush1.bf16.msra.mxu0 %v2963_v28  ;;  %v1023_v36 = vsub.f32 1.0, %v991_v31  ;;  %v1032_v11 = vsub.f32 1.0, %v1000_v40  ;;  %v999_v57 = vmul.f32 %v3611_v25, %v3611_v25  ;;  %v1007_v45 = vmul.f32 %v3637_v60, %v3637_v60 }
 0x131   :  { %v3140_v39 = vpop.eup %3139  ;;  %v2999_v28 = vpack.c.bf16 %v3799_v26, %v3796_v30  ;;  %v1063_v59 = vmul.f32 %v3486_v3, %v1015_v15  ;;  %v1040_v49 = vsub.f32 1.0, %v1008_v46  ;;  %v4518_v15 = vpack.c.bf16 %v3522_v52, %v3500_v24 }
 0x132   :  { %v3142_v44 = vpop.eup %3141  ;;  %v2959_v27 = vpack.c.bf16 %v3140_v39, %v3132_v47  ;;  %v1071_v42 = vmul.f32 %v3496_v22, %v1023_v36  ;;  %v1031_v7 = vsub.f32 1.0, %v999_v57  ;;  %v1039_v17 = vsub.f32 1.0, %v1007_v45 }
 0x133   :  { %v3144_v55 = vpop.eup %3143  ;;  %v2967_v35 = vpack.c.bf16 %v3142_v44, %v3134_v63  ;;  %v1080_v31 = vmul.f32 %v3536_v4, %v1032_v11  ;;  %v1088_v40 = vmul.f32 %v3538_v6, %v1040_v49  ;;  %v4520_v36 = vpack.c.bf16 %v3570_v43, %v3564_v34 }
 0x134   :  { %v3146_v19 = vpop.eup %3145  ;;  %v2957_v8 = vpack.c.bf16 %v3144_v55, %v3136_v51  ;;  %v3001_v47 = vpack.c.bf16 %v1071_v42, %v1063_v59  ;;  %v1079_v60 = vmul.f32 %v3536_v4, %v1031_v7  ;;  %v1087_v3 = vmul.f32 %v3538_v6, %v1039_v17 }
 0x135   :  { %v3148_v25 = vpop.eup %3147  ;;  %v2965_v1 = vpack.c.bf16 %v3146_v19, %v3138_v37  ;;  %v3003_v63 = vpack.c.bf16 %v1088_v40, %v1080_v31  ;;  %v3228_v51 = vmov 0.0|0.0   ;;  %v4519_v6 = vpack.c.bf16 %v3529_v61, %v3503_v32 }
 0x136   :  { %v3150_v30 = vpop.eup %3149  ;;  %2958 = vmatprep.subr.bf16.mxu1 %v2957_v8  ;;  %v3005_v26 = vpack.c.bf16 %v1087_v3, %v1079_v60  ;;  %v4521_v24 = vpack.c.bf16 %v3600_v13, %v3594_v0  ;;  %v4522_v52 = vpack.c.bf16 %v3620_v38, %v3603_v14  ;;  %v4523_v32 = vpack.c.bf16 %v3668_v20, %v3665_v48 }
 0x137   :  { %2966 = vmatprep.subr.bf16.mxu0 %v2965_v1  ;;  %2960 = vmatpush1.bf16.msra.mxu1 %v2959_v27  ;;  %v2970_v22 = vpack.c.bf16 %v3148_v25, %v3150_v30  ;;  %v3152_v37 = vpop.eup %3151  ;;  %v4524_v61 = vpack.c.bf16 %v3671_v21, %v3652_v29  ;;  %v4525_v34 = vpack.c.bf16 %v3710_v12, %v3699_v50  ;;  %v3872_v43 = vstv %s2822_s0 }
 0x138   :  { %2968 = vmatpush1.bf16.msra.mxu0 %v2967_v35  ;;  %2969 = vmatprep.subr.bf16.mxu1 %v3228_v51  ;;  %v3154_v39 = vpop.eup %3153  ;;  %v3879_v0 = vstv %s37_s5  ;;  %v3881_v13 = vstv %s2811_s25  ;;  %v3883_v14 = vstv %s2815_s26  ;;  %v3885_v38 = vstv %s2816_s27 }
 0x139   :  { %2976 = vmatprep.subr.bf16.mxu0 %v4518_v15  ;;  %v2973_v4 = vpack.c.bf16 %v3152_v37, %v3154_v39  ;;  %v3887_v29 = vstv %s2817_s28  ;;  %v3889_v48 = vstv %s2818_s30  ;;  %v3891_v20 = vstv %s2820_s7 }
 0x13a   :  { %2869 = vmatmul.mubr.msk.f32.vlgmr.msra.gmra.mrb[38].mxu1 %vm1090_vm1, %v3561_v33  ;;  %v3893_v21 = vstv %s2826_s8  ;;  %v3896_v56 = vstv %s2812_s10  ;;  %v3898_v23 = vstv %s2813_s11  ;;  %v3904_v58 = vstv %s2814_s3 }
 0x13b   :  { %2870 = vmatmul.mubr.msk.f32.vlgmr.msra.gmra.mrb[42].mxu0 %vm1090_vm1, %v3561_v33  ;;  %2971 = vmatpush3.bf16.msra.mxu1 %v2970_v22  ;;  %v2620_v15 = vlaneseq }
 0x13c   :  { %2978 = vmatpush1.bf16.msra.mxu0 %v4519_v6  ;;  %2972 = vmatprep.subr.bf16.mxu1 %v3228_v51 }
 0x13d   :  { %2980 = vmatprep.subr.bf16.mxu0 %v4520_v36  ;;  %2902 = vmatprep.mubr.msk.f32.mxu1 %vm3229_vm2, %v3226_v5 }
 0x13e   :  { %1796 = vmatprep.mubr.f32.mxu0 %v3226_v5 }
 0x13f   :  { %2974 = vmatpush3.bf16.msra.mxu1 %v2973_v4 }
 0x140   :  { %2982 = vmatpush1.bf16.msra.mxu0 %v4521_v24  ;;  %2984 = vmatprep.subr.bf16.mxu1 %v4522_v52 }
 0x141   :  { %2992 = vmatprep.subr.bf16.mxu0 %v4523_v32 }
 0x142   :  { %2903 = vmatmul.mubr.msk.f32.vlgmr.msra.gmra.mrb[40].mxu1 %vm1090_vm1, %v3561_v33 }
 0x143   :  { %2872 = vmatmul.mubr.msk.f32.vlgmr.msra.gmra.mrb[44].mxu0 %vm1090_vm1, %v3561_v33  ;;  %2986 = vmatpush1.bf16.msra.mxu1 %v4524_v61 }
 0x144   :  { %2994 = vmatpush1.bf16.msra.mxu0 %v4525_v34  ;;  %2988 = vmatprep.subr.bf16.mxu1 %v2987_v53  ;;  %v3900_v53 = vstv %s2819_s9 }
 0x145   :  { %2996 = vmatprep.subr.bf16.mxu0 %v2995_v18  ;;  %1867 = vmatprep.mubr.f32.mxu1 %v3226_v5 }
 0x146   :  { %1938 = vmatprep.mubr.f32.mxu0 %v3226_v5 }
 0x147   :  { %2990 = vmatpush1.bf16.msra.mxu1 %v2989_v16  ;;  %v3906_v16 = vstv %s2824_s12 }
 0x148   :  { %2998 = vmatpush1.bf16.msra.mxu0 %v2997_v54  ;;  %3000 = vmatprep.subr.bf16.mxu1 %v2999_v28 }
 0x14a   :  { %2873 = vmatmul.mubr.msk.f32.vlgmr.msra.gmra.mrb[42].mxu1 %vm1090_vm1, %v3561_v33 }
 0x14b   :  { %2874 = vmatmul.mubr.msk.f32.vlgmr.msra.gmra.mrb[46].mxu0 %vm1090_vm1, %v3561_v33  ;;  %3002 = vmatpush1.bf16.msra.mxu1 %v3001_v47 }
 0x14c   :  { %3004 = vmatprep.subr.bf16.mxu1 %v3003_v63  ;;  %2009 = vmatprep.mubr.f32.mxu1 %v3226_v5  ;;  %v3870_v5 = vstv %s2821_s29 }
 0x14f   :  { %3006 = vmatpush1.bf16.msra.mxu1 %v3005_v26 }
 0x152   :  { %2875 = vmatmul.mubr.msk.f32.vlgmr.msra.gmra.mrb[44].mxu1 %vm1090_vm1, %v3561_v33  ;;  %v3877_v33 = vld [vmem:[%s4488_s2 + $0x1] sm:$0x1] }
 0x1dc   :  { %v1160_v50 = vpop.f32.mrb[32].mxu1 }
 0x1dd   :  { %v2017_v62 = vadd.f32 %v3870_v5, %v1160_v50  ;;  %v2026_v9 = vadd.f32 %v3872_v43, %v1160_v50  ;;  %v1162_v18 = vpop.f32.mrb[33].mxu1  ;;  %v1231_v10 = vpop.f32.mrb[36].mxu0 }
 0x1de   :  { %v2018_v2 = vadd.f32 %v3870_v5, %v1162_v18  ;;  %v2027_v41 = vadd.f32 %v3872_v43, %v1162_v18  ;;  %v2019_v54 = vadd.f32 %v3870_v5, %v1231_v10  ;;  %v2028_v46 = vadd.f32 %v3872_v43, %v1231_v10  ;;  %v1233_v11 = vpop.f32.mrb[37].mxu0 }
 0x1df   :  { %v3913_v57 = vsub.f32 %v2017_v62, %v3879_v0  ;;  %v3916_v44 = vsub.f32 %v2026_v9, %v3881_v13  ;;  %v2232_v27 = vmul.f32 %v3883_v14, %v2017_v62  ;;  %v2250_v28 = vmul.f32 %v3887_v29, %v2026_v9 }
 0x1e0   :  { %v3921_v45 = vsub.f32 %v2018_v2, %v3879_v0  ;;  %v3924_v55 = vsub.f32 %v2027_v41, %v3881_v13  ;;  %v2233_v35 = vmul.f32 %v3883_v14, %v2018_v2  ;;  %v2251_v59 = vmul.f32 %v3887_v29, %v2027_v41 }
 0x1e1   :  { %v2140_v42 = vmul.f32 %v3913_v57, %v3913_v57  ;;  %v2148_v49 = vmul.f32 %v3916_v44, %v3916_v44  ;;  %v3933_v19 = vadd.f32 %v3885_v38, %v2232_v27  ;;  %v3936_v8 = vadd.f32 %v3889_v48, %v2250_v28 }
 0x1e2   :  { %v2141_v7 = vmul.f32 %v3921_v45, %v3921_v45  ;;  %v2149_v17 = vmul.f32 %v3924_v55, %v3924_v55  ;;  %v3945_v25 = vadd.f32 %v3885_v38, %v2233_v35  ;;  %v3948_v1 = vadd.f32 %v3889_v48, %v2251_v59 }
 0x1e3   :  { %v2164_v47 = vrot.slane %v2148_v49, 1  ;;  %v2267_v31 = vmul.f32 %v3933_v19, %v3933_v19  ;;  %v2275_v40 = vmul.f32 %v3936_v8, %v3936_v8  ;;  %v3955_v30 = vsub.f32 %v2019_v54, %v3879_v0 }
 0x1e4   :  { %v2165_v60 = vrot.slane %v2149_v17, 1  ;;  %v2268_v3 = vmul.f32 %v3945_v25, %v3945_v25  ;;  %v2276_v22 = vmul.f32 %v3948_v1, %v3948_v1  ;;  %v3962_v63 = vsub.f32 %v2028_v46, %v3881_v13 }
 0x1e5   :  { %v2180_v51 = vadd.f32 %v2164_v47, %v2140_v42  ;;  %v2291_v26 = vrot.slane %v2275_v40, 1  ;;  %v2234_v37 = vmul.f32 %v3883_v14, %v2019_v54  ;;  %v2142_v4 = vmul.f32 %v3955_v30, %v3955_v30 }
 0x1e6   :  { %4526 = vst [vmem:[#allocation8_spill] sm:$0xff] %v3962_v63  ;;  %v2292_v39 = vrot.slane %v2276_v22, 1  ;;  %v2150_v6 = vmul.f32 %v3962_v63, %v3962_v63  ;;  %v2252_v36 = vmul.f32 %v3887_v29, %v2028_v46  ;;  %v2181_v52 = vadd.f32 %v2165_v60, %v2141_v7 }
 0x1e7   :  { %v2307_v24 = vadd.f32 %v2291_v26, %v2267_v31  ;;  %v3971_v32 = vadd.f32 %v3885_v38, %v2234_v37  ;;  %v2020_v61 = vadd.f32 %v3870_v5, %v1233_v11  ;;  %3155 = vrcp.f32 %v2180_v51 }
 0x1e8   :  { %v2308_v34 = vadd.f32 %v2292_v39, %v2268_v3  ;;  %v2166_v50 = vrot.slane %v2150_v6, 1  ;;  %v3975_v62 = vadd.f32 %v3889_v48, %v2252_v36  ;;  %v2029_v9 = vadd.f32 %v3872_v43, %v1233_v11 }
 0x1e9   :  { %3157 = vrcp.f32 %v2307_v24  ;;  %v3979_v18 = vsub.f32 %v2020_v61, %v3879_v0  ;;  %v3982_v10 = vstv %s3938_s4  ;;  %v2269_v2 = vmul.f32 %v3971_v32, %v3971_v32 }
 0x1ea   :  { %4528 = vst [vmem:[#allocation10_spill] sm:$0xff] %v3982_v10  ;;  %3159 = vrcp.f32 %v2308_v34  ;;  %v2277_v41 = vmul.f32 %v3975_v62, %v3975_v62  ;;  %v2235_v54 = vmul.f32 %v3883_v14, %v2020_v61  ;;  %v3990_v46 = vsub.f32 %v2029_v9, %v3881_v13 }
 0x1eb   :  { %4527 = vst [vmem:[#allocation9_spill] sm:$0xff] %v3979_v18  ;;  %3161 = vrcp.f32 %v2181_v52  ;;  %v2253_v11 = vmul.f32 %v3887_v29, %v2029_v9  ;;  %v3993_v27 = vand.u32 127, %v2620_v15  ;;  %v2182_v28 = vadd.f32 %v2166_v50, %v2142_v4 }
 0x1ec   :  { %4529 = vst [vmem:[#allocation11_spill] sm:$0xff] %v3990_v46  ;;  %v2293_v35 = vrot.slane %v2277_v41, 1  ;;  %v2143_v59 = vmul.f32 %v3979_v18, %v3979_v18  ;;  %v3998_v42 = vadd.f32 %v3885_v38, %v2235_v54  ;;  %v2151_v7 = vmul.f32 %v3990_v46, %v3990_v46 }
 0x1ed   :  { %4530 = vst [vmem:[#allocation12_spill] sm:$0xff] %v3993_v27  ;;  %v1302_v49 = vpop.f32.mrb[34].mxu1  ;;  %v4003_v17 = vadd.f32 %v3889_v48, %v2253_v11  ;;  %v4014_v37 = vmul.f32 %v3900_v53, %v3933_v19 }
 0x1ee   :  { %4531 = vst [vmem:[#allocation13_spill] sm:$0xff] %v3998_v42  ;;  %v2021_v47 = vadd.f32 %v3870_v5, %v1302_v49  ;;  %v2030_v31 = vadd.f32 %v3872_v43, %v1302_v49  ;;  %v1304_v40 = vpop.f32.mrb[35].mxu1  ;;  %v1373_v60 = vpop.f32.mrb[38].mxu0  ;;  %v2309_v3 = vadd.f32 %v2293_v35, %v2269_v2  ;;  %v2270_v22 = vmul.f32 %v3998_v42, %v3998_v42 }
 0x1ef   :  { %4532 = vst [vmem:[#allocation14_spill] sm:$0xff] %v4003_v17  ;;  %v2022_v51 = vadd.f32 %v3870_v5, %v1304_v40  ;;  %v4010_v26 = vpop.f32.mrb[39].mxu0  ;;  %v2167_v15 = vrot.slane %v2151_v7, 1  ;;  %v2278_v39 = vmul.f32 %v4003_v17, %v4003_v17  ;;  %v2031_v52 = vadd.f32 %v3872_v43, %v1304_v40 }
 0x1f0   :  { %v4019_v4 = vsub.f32 %v2021_v47, %v3879_v0  ;;  %v4022_v6 = vsub.f32 %v2030_v31, %v3881_v13  ;;  %3163 = vrcp.f32 %v2309_v3  ;;  %v2236_v36 = vmul.f32 %v3883_v14, %v2021_v47 }
 0x1f1   :  { %v2254_v24 = vmul.f32 %v3887_v29, %v2030_v31  ;;  %v2183_v61 = vadd.f32 %v2167_v15, %v2143_v59  ;;  %v2294_v34 = vrot.slane %v2278_v39, 1  ;;  %v4030_v9 = vsub.f32 %v2022_v51, %v3879_v0  ;;  %v4032_v2 = vpop.eup %3155 }
 0x1f2   :  { %4533 = vst [vmem:[#allocation15_spill] sm:$0xff] %v4019_v4  ;;  %4534 = vst [vmem:[#allocation16_spill] sm:$0xff] %v4022_v6  ;;  %v2152_v50 = vmul.f32 %v4022_v6, %v4022_v6  ;;  %3165 = vrcp.f32 %v2182_v28  ;;  %v4035_v41 = vadd.f32 %v3885_v38, %v2236_v36  ;;  %v4041_v11 = vsub.f32 %v2031_v52, %v3881_v13 }
 0x1f3   :  { %4535 = vst [vmem:[#allocation17_spill] sm:$0xff] %v4030_v9  ;;  %v4038_v54 = vadd.f32 %v3889_v48, %v2254_v24  ;;  %v3158_v35 = vpop.eup %3157  ;;  %v2310_v59 = vadd.f32 %v2294_v34, %v2270_v22  ;;  %v2144_v49 = vmul.f32 %v4019_v4, %v4019_v4  ;;  %v2237_v47 = vmul.f32 %v3883_v14, %v2022_v51 }
 0x1f4   :  { %4536 = vst [vmem:[#allocation18_spill] sm:$0xff] %v4041_v11  ;;  %v2168_v7 = vrot.slane %v2152_v50, 1  ;;  %v3160_v31 = vpop.eup %3159  ;;  %v2412_v40 = vrot.slane %v3158_v35, 7  ;;  %3167 = vrcp.f32 %v2183_v61  ;;  %v2271_v28 = vmul.f32 %v4035_v41, %v4035_v41 }
 0x1f5   :  { %v2279_v3 = vmul.f32 %v4038_v54, %v4038_v54  ;;  %v4050_v15 = vpop.eup %3161  ;;  %v2413_v39 = vrot.slane %v3160_v31, 7  ;;  %3169 = vrcp.f32 %v2310_v59  ;;  %v2145_v22 = vmul.f32 %v4030_v9, %v4030_v9 }
 0x1f6   :  { %4537 = vst [vmem:[#allocation19_spill] sm:$0xff] %v4050_v15  ;;  %v4056_v36 = vmul.f32 %v3900_v53, %v3936_v8  ;;  %v4059_v51 = vmul.f32 %v3158_v35, %v3933_v19  ;;  %v4062_v24 = vmul.f32 %v3160_v31, %v3945_v25  ;;  %v2153_v34 = vmul.f32 %v4041_v11, %v4041_v11 }
 0x1f7   :  { %v2295_v61 = vrot.slane %v2279_v3, 1  ;;  %v2184_v50 = vadd.f32 %v2168_v7, %v2144_v49  ;;  %v4067_v59 = vadd.f32 %v3885_v38, %v2237_v47  ;;  %v2255_v12 = vmul.f32 %v3887_v29, %v2031_v52 }
 0x1f8   :  { %v2023_v9 = vadd.f32 %v3870_v5, %v1373_v60  ;;  %v4072_v27 = vmul.f32 %v2412_v40, %v3936_v8  ;;  %v2169_v35 = vrot.slane %v2153_v34, 1  ;;  %v2032_v31 = vadd.f32 %v3872_v43, %v1373_v60 }
 0x1f9   :  { %4538 = vst [vmem:[#allocation20_spill] sm:$0xff] %v4067_v59  ;;  %v2311_v19 = vadd.f32 %v2295_v61, %v2271_v28  ;;  %v4076_v3 = vmul.f32 %v2413_v39, %v3948_v1  ;;  %v4079_v11 = vadd.f32 %v3889_v48, %v2255_v12  ;;  %v2024_v60 = vadd.f32 %v3870_v5, %v4010_v26 }
 0x1fa   :  { %v4082_v49 = vsub.f32 %v2023_v9, %v3879_v0  ;;  %v2238_v52 = vmul.f32 %v3883_v14, %v2023_v9  ;;  %v3164_v7 = vpop.eup %3163  ;;  %v4086_v8 = vsub.f32 %v2032_v31, %v3881_v13  ;;  %v2256_v47 = vmul.f32 %v3887_v29, %v2032_v31 }
 0x1fb   :  { %4539 = vst [vmem:[#allocation21_spill] sm:$0xff] %v4079_v11  ;;  %3171 = vrcp.f32 %v2311_v19  ;;  %v2414_v40 = vrot.slane %v3164_v7, 7  ;;  %v2185_v28 = vadd.f32 %v2169_v35, %v2145_v22  ;;  %v2272_v12 = vmul.f32 %v4067_v59, %v4067_v59 }
 0x1fc   :  { %4540 = vst [vmem:[#allocation22_spill] sm:$0xff] %v4082_v49  ;;  %4541 = vst [vmem:[#allocation23_spill] sm:$0xff] %v4086_v8  ;;  %v2280_v39 = vmul.f32 %v4079_v11, %v4079_v11  ;;  %v4095_v61 = vpop.eup %3165  ;;  %v2146_v9 = vmul.f32 %v4082_v49, %v4082_v49  ;;  %v2154_v34 = vmul.f32 %v4086_v8, %v4086_v8  ;;  %3173 = vrcp.f32 %v2184_v50 }
 0x1fd   :  { %4542 = vst [vmem:[#allocation24_spill] sm:$0xff] %v4095_v61  ;;  %v4102_v19 = vadd.f32 %v3885_v38, %v2238_v52  ;;  %v4105_v31 = vadd.f32 %v3889_v48, %v2256_v47  ;;  %v1444_v22 = vpop.f32.mrb[36].mxu1  ;;  %v2033_v11 = vadd.f32 %v3872_v43, %v4010_v26  ;;  %v4110_v59 = vsub.f32 %v2024_v60, %v3879_v0 }
 0x1fe   :  { %v2296_v35 = vrot.slane %v2280_v39, 1  ;;  %v1446_v46 = vpop.f32.mrb[37].mxu1  ;;  %v1515_v49 = vpop.f32.mrb[40].mxu0  ;;  %v2170_v8 = vrot.slane %v2154_v34, 1  ;;  %v2239_v50 = vmul.f32 %v3883_v14, %v2024_v60  ;;  %v4120_v26 = vmul.f32 %v3164_v7, %v3971_v32 }
 0x1ff   :  { %4543 = vst [vmem:[#allocation25_spill] sm:$0xff] %v4110_v59  ;;  %v4112_v18 = vpop.eup %3167  ;;  %v2273_v52 = vmul.f32 %v4102_v19, %v4102_v19  ;;  %v2281_v47 = vmul.f32 %v4105_v31, %v4105_v31  ;;  %v1517_v39 = vpop.f32.mrb[41].mxu0  ;;  %v4123_v4 = vsub.f32 %v2033_v11, %v3881_v13  ;;  %v4127_v34 = vmul.f32 %v2414_v40, %v3975_v62 }
 0x200   :  { %4544 = vst [vmem:[#allocation26_spill] sm:$0xff] %v4112_v18  ;;  %v3170_v6 = vpop.eup %3169  ;;  %v2312_v0 = vadd.f32 %v2296_v35, %v2272_v12  ;;  %v2257_v18 = vmul.f32 %v3887_v29, %v2033_v11  ;;  %3175 = vrcp.f32 %v2185_v28  ;;  %v2186_v61 = vadd.f32 %v2170_v8, %v2146_v9 }
 0x201   :  { %4545 = vst [vmem:[#allocation27_spill] sm:$0xff] %v4123_v4  ;;  %v2297_v10 = vrot.slane %v2281_v47, 1  ;;  %v2415_v63 = vrot.slane %v3170_v6, 7  ;;  %v2155_v60 = vmul.f32 %v4123_v4, %v4123_v4  ;;  %v4132_v15 = vadd.f32 %v3885_v38, %v2239_v50 }
 0x202   :  { %v4135_v7 = vadd.f32 %v3889_v48, %v2257_v18  ;;  %3177 = vrcp.f32 %v2312_v0  ;;  %v2147_v11 = vmul.f32 %v4110_v59, %v4110_v59  ;;  %v2500_v40 = vadd.f32 %v3870_v5, %v1444_v22 }
 0x203   :  { %4546 = vst [vmem:[#allocation28_spill] sm:$0xff] %v4132_v15  ;;  %v2313_v13 = vadd.f32 %v2297_v10, %v2273_v52  ;;  %3179 = vrcp.f32 %v2186_v61  ;;  %v2171_v8 = vrot.slane %v2155_v60, 1  ;;  %v2524_v12 = vadd.f32 %v3872_v43, %v1444_v22 }
 0x204   :  { %4547 = vst [vmem:[#allocation29_spill] sm:$0xff] %v4135_v7  ;;  %v2282_v28 = vmul.f32 %v4135_v7, %v4135_v7  ;;  %v2274_v35 = vmul.f32 %v4132_v15, %v4132_v15  ;;  %v2508_v18 = vmul.f32 %v2500_v40, %v3883_v14  ;;  %v2501_v10 = vadd.f32 %v3870_v5, %v1446_v46 }
 0x205   :  { %v3172_v9 = vpop.eup %3171  ;;  %v2525_v52 = vadd.f32 %v3872_v43, %v1446_v46  ;;  %v4149_v47 = vmul.f32 %v3170_v6, %v3998_v42  ;;  %v4152_v61 = vmul.f32 %v2415_v63, %v4003_v17  ;;  %3181 = vrcp.f32 %v2313_v13 }
 0x206   :  { %v2298_v50 = vrot.slane %v2282_v28, 1  ;;  %v2516_v22 = vadd.f32 %v2508_v18, %v3885_v38  ;;  %v2532_v0 = vmul.f32 %v2524_v12, %v3887_v29  ;;  %v2509_v60 = vmul.f32 %v2501_v10, %v3883_v14  ;;  %v4158_v7 = vpop.eup %3173 }
 0x207   :  { %4548 = vst [vmem:[#allocation30_spill] sm:$0xff] %v4149_v47  ;;  %4549 = vst [vmem:[#allocation31_spill] sm:$0xff] %v4152_v61  ;;  %v2533_v40 = vmul.f32 %v2525_v52, %v3887_v29  ;;  %v4161_v46 = vmul.f32 %v3172_v9, %v4035_v41  ;;  %v2416_v6 = vrot.slane %v3172_v9, 7  ;;  %v2187_v15 = vadd.f32 %v2171_v8, %v2147_v11 }
 0x208   :  { %4550 = vst [vmem:[#allocation32_spill] sm:$0xff] %v4158_v7  ;;  %v2502_v63 = vadd.f32 %v3870_v5, %v1515_v49  ;;  %v2314_v4 = vadd.f32 %v2298_v50, %v2274_v35  ;;  %v2540_v13 = vadd.f32 %v2532_v0, %v3889_v48  ;;  %v2517_v28 = vadd.f32 %v2509_v60, %v3885_v38 }
 0x209   :  { %v2541_v12 = vadd.f32 %v2533_v40, %v3889_v48  ;;  %v2548_v18 = vmul.f32 %v2516_v22, %v2516_v22  ;;  %v2526_v52 = vadd.f32 %v3872_v43, %v1515_v49  ;;  %v2503_v59 = vadd.f32 %v3870_v5, %v1517_v39 }
 0x20a   :  { %v2510_v10 = vmul.f32 %v2502_v63, %v3883_v14  ;;  %v4170_v47 = vpop.eup %3175  ;;  %v2556_v9 = vmul.f32 %v2540_v13, %v2540_v13  ;;  %v2549_v11 = vmul.f32 %v2517_v28, %v2517_v28  ;;  %v2527_v35 = vadd.f32 %v3872_v43, %v1517_v39 }
 0x20b   :  { %4551 = vst [vmem:[#allocation33_spill] sm:$0xff] %v4170_v47  ;;  %v2557_v8 = vmul.f32 %v2541_v12, %v2541_v12  ;;  %v4174_v50 = vmul.f32 %v2416_v6, %v4038_v54  ;;  %v2534_v22 = vmul.f32 %v2526_v52, %v3887_v29  ;;  %v2511_v60 = vmul.f32 %v2503_v59, %v3883_v14 }
 0x20c   :  { %v2518_v0 = vadd.f32 %v2510_v10, %v3885_v38  ;;  %v4179_v40 = vpop.eup %3177  ;;  %3183 = vrcp.f32 %v2187_v15  ;;  %v2572_v49 = vrot.slane %v2556_v9, 1  ;;  %v2535_v13 = vmul.f32 %v2527_v35, %v3887_v29 }
 0x20d   :  { %4552 = vst [vmem:[#allocation34_spill] sm:$0xff] %v4174_v50  ;;  %4553 = vst [vmem:[#allocation35_spill] sm:$0xff] %v4179_v40  ;;  %v2573_v63 = vrot.slane %v2557_v8, 1  ;;  %v1586_v28 = vpop.f32.mrb[38].mxu1  ;;  %v4182_v12 = vpop.eup %3179  ;;  %3185 = vrcp.f32 %v2314_v4  ;;  %v2542_v39 = vadd.f32 %v2534_v22, %v3889_v48  ;;  %v2519_v6 = vadd.f32 %v2511_v60, %v3885_v38 }
 0x20e   :  { %4554 = vst [vmem:[#allocation36_spill] sm:$0xff] %v4182_v12  ;;  %v2504_v10 = vadd.f32 %v3870_v5, %v1586_v28  ;;  %v1588_v52 = vpop.f32.mrb[39].mxu1  ;;  %v1657_v47 = vpop.f32.mrb[42].mxu0  ;;  %v2588_v59 = vadd.f32 %v2572_v49, %v2548_v18  ;;  %v2543_v15 = vadd.f32 %v2535_v13, %v3889_v48  ;;  %v2528_v9 = vadd.f32 %v3872_v43, %v1586_v28 }
 0x20f   :  { %v2589_v61 = vadd.f32 %v2573_v63, %v2549_v11  ;;  %v1659_v8 = vpop.f32.mrb[43].mxu0  ;;  %v3182_v35 = vpop.eup %3181  ;;  %v2550_v40 = vmul.f32 %v2518_v0, %v2518_v0  ;;  %v2558_v17 = vmul.f32 %v2542_v39, %v2542_v39  ;;  %v2551_v12 = vmul.f32 %v2519_v6, %v2519_v6 }
 0x210   :  { %v4191_v4 = vmul.f32 %v3900_v53, %v3945_v25  ;;  %v2597_v22 = vsub.f32 %v2588_v59, %v3891_v20  ;;  %v2559_v42 = vmul.f32 %v2543_v15, %v2543_v15  ;;  %v2512_v18 = vmul.f32 %v2504_v10, %v3883_v14 }
 0x211   :  { %v2598_v60 = vsub.f32 %v2589_v61, %v3891_v20  ;;  %v2574_v11 = vrot.slane %v2558_v17, 1  ;;  %v2536_v49 = vmul.f32 %v2528_v9, %v3887_v29  ;;  %v2505_v63 = vadd.f32 %v3870_v5, %v1588_v52 }
 0x212   :  { %v4200_v0 = vmul.f32 %v3900_v53, %v3948_v1  ;;  %v2418_v13 = vrot.slane %v3182_v35, 7  ;;  %v2711_v28 = vmul.f32 %v2597_v22, %v2597_v22  ;;  %v2575_v25 = vrot.slane %v2559_v42, 1 }
 0x213   :  { %v2520_v39 = vadd.f32 %v2512_v18, %v3885_v38  ;;  %v2590_v6 = vadd.f32 %v2574_v11, %v2550_v40  ;;  %v2544_v61 = vadd.f32 %v2536_v49, %v3889_v48  ;;  %v2513_v59 = vmul.f32 %v2505_v63, %v3883_v14 }
 0x214   :  { %v2529_v17 = vadd.f32 %v3872_v43, %v1588_v52  ;;  %v4207_v10 = vmul.f32 %v3182_v35, %v4102_v19  ;;  %v2712_v15 = vmul.f32 %v2598_v60, %v2598_v60  ;;  %v2591_v9 = vadd.f32 %v2575_v25, %v2551_v12 }
 0x215   :  { %v2552_v7 = vmul.f32 %v2520_v39, %v2520_v39  ;;  %v1728_v1 = vpop.f32.mrb[40].mxu1  ;;  %v2599_v50 = vsub.f32 %v2590_v6, %v3891_v20  ;;  %v2560_v22 = vmul.f32 %v2544_v61, %v2544_v61  ;;  %v2521_v42 = vadd.f32 %v2513_v59, %v3885_v38 }
 0x216   :  { %4555 = vst [vmem:[#allocation37_spill] sm:$0xff] %v4207_v10  ;;  %v2537_v40 = vmul.f32 %v2529_v17, %v3887_v29  ;;  %v1798_v18 = vpop.f32.mrb[44].mxu0  ;;  %v2904_v11 = vpop.f32.mrb[41].mxu1  ;;  %v2600_v52 = vsub.f32 %v2591_v9, %v3891_v20  ;;  %v2506_v35 = vadd.f32 %v3870_v5, %v1657_v47  ;;  %v2530_v60 = vadd.f32 %v3872_v43, %v1657_v47 }
 0x217   :  { %v4212_v49 = vpop.eup %3183  ;;  %v2507_v12 = vadd.f32 %v3870_v5, %v1659_v8  ;;  %v4218_v63 = vpop.f32.mrb[45].mxu0  ;;  %v4223_v39 = vmul.f32 %v2418_v13, %v4105_v31  ;;  %v4226_v6 = vmul.f32 %v3893_v21, %v2711_v28  ;;  %v2576_v61 = vrot.slane %v2560_v22, 1 }
 0x218   :  { %4556 = vst [vmem:[#allocation38_spill] sm:$0xff] %v4212_v49  ;;  %v4220_v25 = vpop.eup %3185  ;;  %v2545_v59 = vadd.f32 %v2537_v40, %v3889_v48  ;;  %v4230_v17 = vmul.f32 %v3893_v21, %v2712_v15  ;;  %v2514_v47 = vmul.f32 %v2506_v35, %v3883_v14  ;;  %v2538_v9 = vmul.f32 %v2530_v60, %v3887_v29  ;;  %v2606_v15 = vld [vmem:[%s4488_s2] sm:$0x1]  ;;  %s2823_s2 = sld [smem:[#allocation2 + $0xd]] }
 0x219   :  { %4557 = vst [vmem:[#allocation39_spill] sm:$0xff] %v4220_v25  ;;  %4558 = vst [vmem:[#allocation40_spill] sm:$0xff] %v4223_v39  ;;  %v2515_v11 = vmul.f32 %v2507_v12, %v3883_v14  ;;  %v2713_v49 = vmul.f32 %v2599_v50, %v2599_v50  ;;  %v2592_v25 = vadd.f32 %v2576_v61, %v2552_v7 }
 0x21a   :  { %v2561_v10 = vmul.f32 %v2545_v59, %v2545_v59  ;;  %v2531_v13 = vadd.f32 %v3872_v43, %v1659_v8  ;;  %v2714_v39 = vmul.f32 %v2600_v52, %v2600_v52  ;;  %v2553_v28 = vmul.f32 %v2521_v42, %v2521_v42 }
 0x21b   :  { %v2522_v22 = vadd.f32 %v2514_v47, %v3885_v38  ;;  %v2546_v40 = vadd.f32 %v2538_v9, %v3889_v48  ;;  %v2523_v60 = vadd.f32 %v2515_v11, %v3885_v38  ;;  %v2605_v7 = vadd.f32 %v3870_v5, %v1728_v1 }
 0x21c   :  { %v2577_v35 = vrot.slane %v2561_v10, 1  ;;  %v2539_v14 = vmul.f32 %v2531_v13, %v3887_v29  ;;  %v2601_v50 = vsub.f32 %v2592_v25, %v3891_v20  ;;  %v2608_v42 = vadd.f32 %v3872_v43, %v1728_v1 }
 0x21d   :  { %v2554_v8 = vmul.f32 %v2522_v22, %v2522_v22  ;;  %v2562_v52 = vmul.f32 %v2546_v40, %v2546_v40  ;;  %v4246_v12 = vpop.f32.mrb[42].mxu1  ;;  %v4249_v61 = vmul.f32 %v3893_v21, %v2713_v49  ;;  %v2607_v47 = vsub.f32 %v2605_v7, %v2606_v15 }
 0x21e   :  { %v2593_v59 = vadd.f32 %v2577_v35, %v2553_v28  ;;  %v2547_v10 = vadd.f32 %v2539_v14, %v3889_v48  ;;  %v4252_v38 = vpop.f32.mrb[46].mxu0  ;;  %v4254_v29 = vpop.f32.mrb[43].mxu1  ;;  %v4559_v25 = vrot.slane %v3877_v33, 7  ;;  %v2060_v11 = vrot.slane %v1798_v18, 1 }
 0x21f   :  { %v2578_v5 = vrot.slane %v2562_v52, 1  ;;  %v2084_v13 = vrot.slane %v1798_v18, 7  ;;  %v4258_v43 = vpop.f32.mrb[47].mxu0  ;;  %v4261_v1 = vmul.f32 %v3893_v21, %v2714_v39  ;;  %v4263_v49 = vmul.f32 %v2523_v60, %v2523_v60 }
 0x220   :  { %v2613_v9 = vsub.f32 %v2608_v42, %v4559_v25  ;;  %v4265_v28 = vmul.f32 %v2547_v10, %v2547_v10  ;;  %v2205_v48 = vmul.f32 %v3896_v56, %v1798_v18  ;;  %v4268_v22 = vmul.f32 %v2601_v50, %v2601_v50 }
 0x221   :  { %v2594_v40 = vadd.f32 %v2578_v5, %v2554_v8  ;;  %v2076_v15 = vmul.f32 %v2060_v11, %v3913_v57  ;;  %v2100_v33 = vmul.f32 %v2084_v13, %v3916_v44  ;;  %v4273_v35 = vsub.f32 %v2593_v59, %v3891_v20 }
 0x222   :  { %v4275_v14 = vmul.f32 %v2607_v47, %v2607_v47  ;;  %v2214_v39 = vmul.f32 %v3898_v23, %v1798_v18  ;;  %v2332_v60 = vadd.f32 %v4014_v37, %v2205_v48  ;;  %v2579_v7 = vrot.slane %v4265_v28, 1 }
 0x223   :  { %v4280_v52 = vmul.f32 %v2613_v9, %v2613_v9  ;;  %v2116_v50 = vrot.slane %v2100_v33, 1  ;;  %v2444_v42 = vrot.slane %v2205_v48, 7  ;;  %v4283_v8 = vsub.f32 %v2594_v40, %v3891_v20 }
 0x224   :  { %v2348_v57 = vadd.f32 %v4056_v36, %v2214_v39  ;;  %v2372_v44 = vrot.slane %v2214_v39, 1  ;;  %v2629_v59 = vmul.f32 %v2332_v60, %v2332_v60  ;;  %v2061_v18 = vrot.slane %v4218_v63, 1 }
 0x225   :  { %v2132_v10 = vsub.f32 %v2076_v15, %v2116_v50  ;;  %v2460_v47 = vmul.f32 %v2444_v42, %v4072_v27  ;;  %v2085_v37 = vrot.slane %v4218_v63, 7  ;;  %v4289_v5 = vpop.f32.mrb[44].mxu1  ;;  %v2206_v11 = vmul.f32 %v3896_v56, %v4218_v63 }
 0x226   :  { %v2388_v25 = vmul.f32 %v2372_v44, %v4059_v51  ;;  %v2637_v9 = vmul.f32 %v2348_v57, %v2348_v57  ;;  %v2215_v36 = vmul.f32 %v3898_v23, %v4218_v63  ;;  %v4296_v13 = vpop.f32.mrb[45].mxu1  ;;  %v2077_v40 = vmul.f32 %v2061_v18, %v3921_v45 }
 0x227   :  { %v2196_v48 = vmul.f32 %v4032_v2, %v2132_v10  ;;  %v2476_v27 = vrot.slane %v2460_v47, 1  ;;  %v2101_v15 = vmul.f32 %v2085_v37, %v3924_v55  ;;  %v2333_v39 = vadd.f32 %v4191_v4, %v2206_v11 }
 0x228   :  { %v2653_v33 = vrot.slane %v2637_v9, 1  ;;  %v2349_v51 = vadd.f32 %v4200_v0, %v2215_v36  ;;  %v2373_v60 = vrot.slane %v2215_v36, 1  ;;  %v2445_v57 = vrot.slane %v2206_v11, 7 }
 0x229   :  { %v2223_v50 = vmul.f32 %v3904_v58, %v2196_v48  ;;  %v2117_v42 = vrot.slane %v2101_v15, 1  ;;  %v2062_v63 = vrot.slane %v4246_v12, 1  ;;  %v2630_v10 = vmul.f32 %v2333_v39, %v2333_v39  ;;  %v4561_v15 = vld [vmem:[#allocation8_spill] sm:$0xff] }
 0x22a   :  { %v2669_v44 = vadd.f32 %v2653_v33, %v2629_v59  ;;  %v2389_v2 = vmul.f32 %v2373_v60, %v4062_v24  ;;  %v2638_v47 = vmul.f32 %v2349_v51, %v2349_v51  ;;  %v2461_v55 = vmul.f32 %v2445_v57, %v4076_v3  ;;  %v4560_v59 = vld [vmem:[#allocation19_spill] sm:$0xff] }
 0x22b   :  { %v2396_v45 = vsub.f32 %v2223_v50, %v2388_v25  ;;  %v2133_v18 = vsub.f32 %v2077_v40, %v2117_v42  ;;  %v2078_v4 = vmul.f32 %v2062_v63, %v3955_v30  ;;  %v2086_v9 = vrot.slane %v4246_v12, 7 }
 0x22c   :  { %v2678_v0 = vmul.f32 %v3906_v16, %v2669_v44  ;;  %v2654_v37 = vrot.slane %v2638_v47, 1  ;;  %v2207_v11 = vmul.f32 %v3896_v56, %v4246_v12  ;;  %v2477_v24 = vrot.slane %v2461_v55, 1 }
 0x22d   :  { %v2492_v36 = vadd.f32 %v2476_v27, %v2396_v45  ;;  %v2197_v48 = vmul.f32 %v4560_v59, %v2133_v18  ;;  %v2216_v25 = vmul.f32 %v3898_v23, %v4246_v12  ;;  %v2102_v3 = vmul.f32 %v2086_v9, %v4561_v15  ;;  %v4562_v12 = vld [vmem:[#allocation10_spill] sm:$0xff] }
 0x22e   :  { %v2670_v40 = vadd.f32 %v2654_v37, %v2630_v10  ;;  %v2326_v30 = vmul.f32 %v3900_v53, %v3971_v32  ;;  %v2342_v33 = vmul.f32 %v3900_v53, %v3975_v62  ;;  %v2446_v27 = vrot.slane %v2207_v11, 7 }
 0x22f   :  { %v2686_v39 = vmul.f32 %v2492_v36, %v2492_v36  ;;  %v2224_v51 = vmul.f32 %v3904_v58, %v2197_v48  ;;  %v2374_v60 = vrot.slane %v2216_v25, 1  ;;  %v2118_v42 = vrot.slane %v2102_v3, 1  ;;  %v4563_v48 = vld [vmem:[#allocation24_spill] sm:$0xff] }
 0x230   :  { %v2679_v50 = vmul.f32 %v3906_v16, %v2670_v40  ;;  %v2334_v57 = vadd.f32 %v2326_v30, %v2207_v11  ;;  %v2350_v63 = vadd.f32 %v2342_v33, %v2216_v25  ;;  %v2462_v32 = vmul.f32 %v2446_v27, %v4127_v34  ;;  %v4564_v40 = vld [vmem:[#allocation15_spill] sm:$0xff] }
 0x231   :  { %v2695_v44 = vmul.f32 %v4562_v12, %v2686_v39  ;;  %v2397_v10 = vsub.f32 %v2224_v51, %v2389_v2  ;;  %v2390_v47 = vmul.f32 %v2374_v60, %v4120_v26  ;;  %v2134_v45 = vsub.f32 %v2078_v4, %v2118_v42  ;;  %v4565_v4 = vld [vmem:[#allocation16_spill] sm:$0xff] }
 0x232   :  { %v2631_v18 = vmul.f32 %v2334_v57, %v2334_v57  ;;  %v2639_v62 = vmul.f32 %v2350_v63, %v2350_v63  ;;  %v2064_v55 = vrot.slane %v4252_v38, 1  ;;  %v2478_v36 = vrot.slane %v2462_v32, 1 }
 0x233   :  { %v2703_v37 = vadd.f32 %v2695_v44, %v2678_v0  ;;  %v2493_v9 = vadd.f32 %v2477_v24, %v2397_v10  ;;  %v2088_v59 = vrot.slane %v4252_v38, 7  ;;  %v2198_v11 = vmul.f32 %v4563_v48, %v2134_v45  ;;  %v4566_v45 = vld [vmem:[#allocation34_spill] sm:$0xff] }
 0x234   :  { %v2655_v25 = vrot.slane %v2639_v62, 1  ;;  %v2080_v15 = vmul.f32 %v2064_v55, %v4564_v40  ;;  %v2209_v26 = vmul.f32 %v3896_v56, %v4252_v38  ;;  %v2218_v0 = vmul.f32 %v3898_v23, %v4252_v38 }
 0x235   :  { %v4332_v34 = vadd.f32 %v4226_v6, %v2703_v37  ;;  %v2687_v2 = vmul.f32 %v2493_v9, %v2493_v9  ;;  %v2104_v3 = vmul.f32 %v2088_v59, %v4565_v4  ;;  %v2225_v24 = vmul.f32 %v3904_v58, %v2198_v11  ;;  %v4567_v9 = vld [vmem:[#allocation32_spill] sm:$0xff] }
 0x236   :  { %v2671_v30 = vadd.f32 %v2655_v25, %v2631_v18  ;;  %v2328_v33 = vmul.f32 %v3900_v53, %v4035_v41  ;;  %v2344_v39 = vmul.f32 %v3900_v53, %v4038_v54  ;;  %v2376_v6 = vrot.slane %v2218_v0, 1  ;;  %v4568_v25 = vld [vmem:[#allocation9_spill] sm:$0xff] }
 0x237   :  { %v2696_v51 = vmul.f32 %v4562_v12, %v2687_v2  ;;  %v2120_v60 = vrot.slane %v2104_v3, 1  ;;  %v2448_v27 = vrot.slane %v2209_v26, 7  ;;  %v2398_v42 = vsub.f32 %v2225_v24, %v2390_v47  ;;  %v4570_v2 = vld [vmem:[#allocation13_spill] sm:$0xff]  ;;  %v4571_v24 = vld [vmem:[#allocation14_spill] sm:$0xff] }
 0x238   :  { %v2680_v57 = vmul.f32 %v3906_v16, %v2671_v30  ;;  %v2336_v63 = vadd.f32 %v2328_v33, %v2209_v26  ;;  %v2352_v44 = vadd.f32 %v2344_v39, %v2218_v0  ;;  %v2392_v32 = vmul.f32 %v2376_v6, %v4161_v46 }
 0x239   :  { %v2704_v38 = vadd.f32 %v2696_v51, %v2679_v50  ;;  %v2136_v10 = vsub.f32 %v2080_v15, %v2120_v60  ;;  %v2464_v18 = vmul.f32 %v2448_v27, %v4566_v45  ;;  %v2494_v41 = vadd.f32 %v2478_v36, %v2398_v42  ;;  %v4569_v15 = vld [vmem:[#allocation11_spill] sm:$0xff] }
 0x23a   :  { %v2633_v62 = vmul.f32 %v2336_v63, %v2336_v63  ;;  %v2641_v55 = vmul.f32 %v2352_v44, %v2352_v44  ;;  %v2063_v54 = vrot.slane %v4254_v29, 1  ;;  %v2087_v48 = vrot.slane %v4254_v29, 7  ;;  %v4572_v63 = vld [vmem:[#allocation31_spill] sm:$0xff] }
 0x23b   :  { %v4348_v37 = vadd.f32 %v4230_v17, %v2704_v38  ;;  %v2200_v47 = vmul.f32 %v4567_v9, %v2136_v10  ;;  %v2480_v59 = vrot.slane %v2464_v18, 1  ;;  %v2688_v11 = vmul.f32 %v2494_v41, %v2494_v41  ;;  %v4573_v38 = vld [vmem:[#allocation12_spill] sm:$0xff] }
 0x23c   :  { %v2657_v50 = vrot.slane %v2641_v55, 1  ;;  %v2079_v40 = vmul.f32 %v2063_v54, %v4568_v25  ;;  %v2208_v46 = vmul.f32 %v3896_v56, %v4254_v29  ;;  %v2103_v26 = vmul.f32 %v2087_v48, %v4569_v15  ;;  %v4575_v54 = vld [vmem:[#allocation26_spill] sm:$0xff]  ;;  %v4578_v25 = vld [vmem:[#allocation20_spill] sm:$0xff] }
 0x23d   :  { %v2227_v36 = vmul.f32 %v3904_v58, %v2200_v47  ;;  %v2217_v17 = vmul.f32 %v3898_v23, %v4254_v29  ;;  %v2327_v4 = vmul.f32 %v3900_v53, %v4570_v2  ;;  %v2697_v3 = vmul.f32 %v4562_v12, %v2688_v11  ;;  %v4577_v11 = vld [vmem:[#allocation18_spill] sm:$0xff] }
 0x23e   :  { %v4362_v0 = vadd.f32 %v2657_v50, %v2633_v62  ;;  %v2343_v30 = vmul.f32 %v3900_v53, %v4571_v24  ;;  %v2447_v33 = vrot.slane %v2208_v46, 7  ;;  %v2119_v51 = vrot.slane %v2103_v26, 1  ;;  %v4580_v26 = vld [vmem:[#allocation35_spill] sm:$0xff] }
 0x23f   :  { %v2400_v39 = vsub.f32 %v2227_v36, %v2392_v32  ;;  %v2335_v60 = vadd.f32 %v2327_v4, %v2208_v46  ;;  %v2375_v6 = vrot.slane %v2217_v17, 1  ;;  %v2617_v27 = vrot.slane %v4280_v52, 1  ;;  %v4574_v32 = vld [vmem:[#allocation30_spill] sm:$0xff]  ;;  %v4579_v36 = vld [vmem:[#allocation21_spill] sm:$0xff] }
 0x240   :  { %v4367_v42 = vadd.f32 %v2697_v3, %v2680_v57  ;;  %v2351_v29 = vadd.f32 %v2343_v30, %v2217_v17  ;;  %v2463_v44 = vmul.f32 %v2447_v33, %v4572_v63  ;;  %vm2752_vm3 = vcmp.lt.s32.totalorder %v4573_v38, 16 }
 0x241   :  { %v4374_v10 = vadd.f32 %v2579_v7, %v4263_v49  ;;  %v2496_v45 = vadd.f32 %v2480_v59, %v2400_v39  ;;  %v2135_v18 = vsub.f32 %v2079_v40, %v2119_v51  ;;  %v2391_v41 = vmul.f32 %v2375_v6, %v4574_v32  ;;  %v4576_v7 = vld [vmem:[#allocation17_spill] sm:$0xff] }
 0x242   :  { %v2632_v62 = vmul.f32 %v2335_v60, %v2335_v60  ;;  %v2640_v55 = vmul.f32 %v2351_v29, %v2351_v29  ;;  %v2065_v52 = vrot.slane %v4258_v43, 1  ;;  %v2089_v57 = vrot.slane %v4258_v43, 7 }
 0x243   :  { %v2199_v9 = vmul.f32 %v4575_v54, %v2135_v18  ;;  %v2479_v47 = vrot.slane %v2463_v44, 1  ;;  %v2210_v48 = vmul.f32 %v3896_v56, %v4258_v43  ;;  %v2219_v49 = vmul.f32 %v3898_v23, %v4258_v43 }
 0x244   :  { %v2656_v28 = vrot.slane %v2640_v55, 1  ;;  %v2081_v59 = vmul.f32 %v2065_v52, %v4576_v7  ;;  %v2105_v50 = vmul.f32 %v2089_v57, %v4577_v11  ;;  %v2329_v40 = vmul.f32 %v3900_v53, %v4578_v25  ;;  %v4581_v55 = vld [vmem:[#allocation33_spill] sm:$0xff] }
 0x245   :  { %v2226_v46 = vmul.f32 %v3904_v58, %v2199_v9  ;;  %v2345_v15 = vmul.f32 %v3900_v53, %v4579_v36  ;;  %v2361_v17 = vmul.f32 %v4580_v26, %v4578_v25  ;;  %v2377_v2 = vrot.slane %v2219_v49, 1 }
 0x246   :  { %v2672_v4 = vadd.f32 %v2656_v28, %v2632_v62  ;;  %v2121_v3 = vrot.slane %v2105_v50, 1  ;;  %v2337_v43 = vadd.f32 %v2329_v40, %v2210_v48  ;;  %v2417_v24 = vrot.slane %v4580_v26, 7  ;;  %v4582_v28 = vld [vmem:[#allocation22_spill] sm:$0xff] }
 0x247   :  { %v2399_v30 = vsub.f32 %v2226_v46, %v2391_v41  ;;  %v2353_v33 = vadd.f32 %v2345_v15, %v2219_v49  ;;  %v2393_v39 = vmul.f32 %v2377_v2, %v2361_v17  ;;  %v2449_v51 = vrot.slane %v2210_v48, 7 }
 0x248   :  { %v2681_v60 = vmul.f32 %v3906_v16, %v2672_v4  ;;  %v2137_v6 = vsub.f32 %v2081_v59, %v2121_v3  ;;  %v2433_v29 = vmul.f32 %v2417_v24, %v4579_v36  ;;  %v2634_v63 = vmul.f32 %v2337_v43, %v2337_v43  ;;  %v4583_v59 = vld [vmem:[#allocation23_spill] sm:$0xff] }
 0x249   :  { %v2495_v44 = vadd.f32 %v2479_v47, %v2399_v30  ;;  %v2642_v18 = vmul.f32 %v2353_v33, %v2353_v33  ;;  %v2619_v32 = vadd.f32 %v2617_v27, %v4275_v14  ;;  %v2066_v62 = vrot.slane %v4289_v5, 1 }
 0x24a   :  { %v2201_v52 = vmul.f32 %v4581_v55, %v2137_v6  ;;  %v2465_v57 = vmul.f32 %v2449_v51, %v2433_v29  ;;  %v2090_v41 = vrot.slane %v4289_v5, 7  ;;  %v2211_v54 = vmul.f32 %v3896_v56, %v4289_v5  ;;  %v4584_v51 = vld [vmem:[#allocation40_spill] sm:$0xff]  ;;  %v4588_v55 = vld [vmem:[#allocation27_spill] sm:$0xff] }
 0x24b   :  { %v2689_v9 = vmul.f32 %v2495_v44, %v2495_v44  ;;  %v2658_v48 = vrot.slane %v2642_v18, 1  ;;  %v2753_v49 = vsel %vm2752_vm3, %v2619_v32, 0.0  ;;  %v2082_v47 = vmul.f32 %v2066_v62, %v4582_v28  ;;  %v4587_v32 = vld [vmem:[#allocation25_spill] sm:$0xff] }
 0x24c   :  { %v2228_v7 = vmul.f32 %v3904_v58, %v2201_v52  ;;  %v2481_v14 = vrot.slane %v2465_v57, 1  ;;  %v2780_v27 = vsel %vm2754_vm4, %v2753_v49, 0.0  ;;  %v2106_v11 = vmul.f32 %v2090_v41, %v4583_v59  ;;  %v4590_v28 = vld [vmem:[#allocation29_spill] sm:$0xff] }
 0x24d   :  { %v2698_v50 = vmul.f32 %v4562_v12, %v2689_v9  ;;  %v2674_v25 = vadd.f32 %v2658_v48, %v2634_v63  ;;  %2781 = vadd.xlane.f32.xlu1 %v2780_v27  ;;  %v2220_v40 = vmul.f32 %v3898_v23, %v4289_v5  ;;  %v2330_v46 = vmul.f32 %v3900_v53, %v4102_v19  ;;  %v4585_v5 = vld [vmem:[#allocation37_spill] sm:$0xff]  ;;  %v4589_v48 = vld [vmem:[#allocation28_spill] sm:$0xff] }
 0x24e   :  { %v2401_v36 = vsub.f32 %v2228_v7, %v2393_v39  ;;  %v2122_v15 = vrot.slane %v2106_v11, 1  ;;  %v2346_v26 = vmul.f32 %v3900_v53, %v4105_v31  ;;  %v2450_v17 = vrot.slane %v2211_v54, 7  ;;  %v4586_v31 = vld [vmem:[#allocation36_spill] sm:$0xff] }
 0x24f   :  { %v2690_v2 = vmul.f32 %v2496_v45, %v2496_v45  ;;  %v4415_v4 = vadd.f32 %v2698_v50, %v2681_v60  ;;  %v2338_v3 = vadd.f32 %v2330_v46, %v2211_v54  ;;  %v2378_v43 = vrot.slane %v2220_v40, 1 }
 0x250   :  { %v2497_v24 = vadd.f32 %v2481_v14, %v2401_v36  ;;  %v2138_v30 = vsub.f32 %v2082_v47, %v2122_v15  ;;  %v2354_v33 = vadd.f32 %v2346_v26, %v2220_v40  ;;  %v2466_v6 = vmul.f32 %v2450_v17, %v4584_v51  ;;  %v4591_v14 = vld [vmem:[#allocation39_spill] sm:$0xff] }
 0x251   :  { %v2394_v29 = vmul.f32 %v2378_v43, %v4585_v5  ;;  %v2635_v63 = vmul.f32 %v2338_v3, %v2338_v3  ;;  %v2067_v19 = vrot.slane %v4296_v13, 1  ;;  %v2091_v39 = vrot.slane %v4296_v13, 7 }
 0x252   :  { %v2691_v44 = vmul.f32 %v2497_v24, %v2497_v24  ;;  %v2202_v18 = vmul.f32 %v4586_v31, %v2138_v30  ;;  %v2482_v45 = vrot.slane %v2466_v6, 1  ;;  %v2643_v60 = vmul.f32 %v2354_v33, %v2354_v33  ;;  %v4592_v24 = vld [vmem:[#allocation38_spill] sm:$0xff] }
 0x253   :  { %v2083_v62 = vmul.f32 %v2067_v19, %v4587_v32  ;;  %v2107_v52 = vmul.f32 %v2091_v39, %v4588_v55  ;;  %v2212_v57 = vmul.f32 %v3896_v56, %v4296_v13  ;;  %v2221_v41 = vmul.f32 %v3898_v23, %v4296_v13 }
 0x254   :  { %v2229_v54 = vmul.f32 %v3904_v58, %v2202_v18  ;;  %v2659_v9 = vrot.slane %v2643_v60, 1  ;;  %v2331_v49 = vmul.f32 %v3900_v53, %v4589_v48  ;;  %v2347_v47 = vmul.f32 %v3900_v53, %v4590_v28 }
 0x255   :  { %v2123_v7 = vrot.slane %v2107_v52, 1  ;;  %v2363_v27 = vmul.f32 %v4591_v14, %v4589_v48  ;;  %v2379_v59 = vrot.slane %v2221_v41, 1  ;;  %v2419_v11 = vrot.slane %v4591_v14, 7 }
 0x256   :  { %v2402_v56 = vsub.f32 %v2229_v54, %v2394_v29  ;;  %v2675_v50 = vadd.f32 %v2659_v9, %v2635_v63  ;;  %v2339_v40 = vadd.f32 %v2331_v49, %v2212_v57  ;;  %v2355_v23 = vadd.f32 %v2347_v47, %v2221_v41 }
 0x257   :  { %v2139_v13 = vsub.f32 %v2083_v62, %v2123_v7  ;;  %v2395_v46 = vmul.f32 %v2379_v59, %v2363_v27  ;;  %v2435_v36 = vmul.f32 %v2419_v11, %v4590_v28  ;;  %v2451_v15 = vrot.slane %v2212_v57, 7 }
 0x258   :  { %v2716_v26 = vmul.f32 %v4273_v35, %v4273_v35  ;;  %v2682_v53 = vmul.f32 %v3906_v16, %v4362_v0  ;;  %v2498_v17 = vadd.f32 %v2482_v45, %v2402_v56  ;;  %v2644_v3 = vmul.f32 %v2355_v23, %v2355_v23 }
 0x259   :  { %v2683_v43 = vmul.f32 %v3906_v16, %v2674_v25  ;;  %v2203_v30 = vmul.f32 %v4592_v24, %v2139_v13  ;;  %v2467_v33 = vmul.f32 %v2451_v15, %v2435_v36  ;;  %v2636_v51 = vmul.f32 %v2339_v40, %v2339_v40 }
 0x25a   :  { %v2660_v6 = vrot.slane %v2644_v3, 1  ;;  %v2692_v5 = vmul.f32 %v2498_v17, %v2498_v17  ;;  %v2699_v29 = vmul.f32 %v4562_v12, %v2690_v2  ;;  %v2700_v63 = vmul.f32 %v4562_v12, %v2691_v44 }
 0x25b   :  { %v2230_v19 = vmul.f32 %v3904_v58, %v2203_v30  ;;  %v2604_v35 = vsub.f32 %v4374_v10, %v3891_v20  ;;  %v2684_v0 = vmul.f32 %v3906_v16, %v2675_v50  ;;  %v2717_v25 = vmul.f32 %v4283_v8, %v4283_v8 }
 0x25c   :  { %v2676_v39 = vadd.f32 %v2660_v6, %v2636_v51  ;;  %v2701_v31 = vmul.f32 %v4562_v12, %v2692_v5  ;;  %v2707_v18 = vadd.f32 %v2699_v29, %v2682_v53  ;;  %v2708_v45 = vadd.f32 %v2700_v63, %v2683_v43 }
 0x25d   :  { %v2403_v60 = vsub.f32 %v2230_v19, %v2395_v46  ;;  %v2483_v32 = vrot.slane %v2467_v33, 1  ;;  %v2724_v2 = vmul.f32 %v3893_v21, %v4268_v22  ;;  %v2725_v58 = vmul.f32 %v3893_v21, %v2716_v26 }
 0x25e   :  { %v2709_v44 = vadd.f32 %v2701_v31, %v2684_v0  ;;  %v2726_v20 = vmul.f32 %v3893_v21, %v2717_v25  ;;  %v2730_v10 = vadd.f32 %v4249_v61, %v4367_v42  ;;  %v2731_v8 = vadd.f32 %v4261_v1, %v4415_v4 }
 0x25f   :  { %v2499_v62 = vadd.f32 %v2483_v32, %v2403_v60  ;;  %v2732_v55 = vadd.f32 %v2724_v2, %v2707_v18  ;;  %v2733_v52 = vadd.f32 %v2725_v58, %v2708_v45  ;;  %v2755_v41 = vsel %vm2754_vm4, %v4332_v34, 0.0 }
 0x260   :  { %v2734_v57 = vadd.f32 %v2726_v20, %v2709_v44  ;;  %v2756_v22 = vsel %vm2754_vm4, %v4348_v37, 0.0  ;;  %v2718_v9 = vmul.f32 %v2604_v35, %v2604_v35  ;;  %v2758_v49 = vsel %vm2754_vm4, %v2730_v10, 0.0 }
 0x261   :  { %v2693_v54 = vmul.f32 %v2499_v62, %v2499_v62  ;;  %v2757_v48 = vadd.f32 %v2756_v22, %v2755_v41  ;;  %v2628_v61 = vadd.s32 896, %v4573_v38  ;;  %v2760_v42 = vsel %vm2754_vm4, %v2731_v8, 0.0 }
 0x262   :  { %v2685_v1 = vmul.f32 %v3906_v16, %v2676_v39  ;;  %v2727_v34 = vmul.f32 %v3893_v21, %v2718_v9  ;;  %v2762_v37 = vsel %vm2754_vm4, %v2732_v55, 0.0  ;;  %v2764_v59 = vsel %vm2754_vm4, %v2733_v52, 0.0 }
 0x263   :  { %v2702_v4 = vmul.f32 %v4562_v12, %v2693_v54  ;;  %v2759_v28 = vadd.f32 %v2758_v49, %v2757_v48  ;;  %vm2743_vm5 = vcmp.lt.s32.totalorder %v2628_v61, 1000  ;;  %v2766_v38 = vsel %vm2754_vm4, %v2734_v57, 0.0 }
 0x264   :  { %v2791_v33 = vstv %s2823_s2 }
 0x265   :  { %v2710_v47 = vadd.f32 %v2702_v4, %v2685_v1  ;;  %v2761_v7 = vadd.f32 %v2760_v42, %v2759_v28 }
 0x267   :  { %v2735_v14 = vadd.f32 %v2727_v34, %v2710_v47  ;;  %v2763_v27 = vadd.f32 %v2762_v37, %v2761_v7 }
 0x269   :  { %v2751_v11 = vsel %vm2743_vm5, %v2735_v14, 0.0  ;;  %v2765_v56 = vadd.f32 %v2764_v59, %v2763_v27 }
 0x26a   :  { %v2768_v16 = vsel %vm2754_vm4, %v2751_v11, 0.0 }
 0x26b   :  { %v2767_v50 = vadd.f32 %v2766_v38, %v2765_v56 }
 0x26d   :  { %v2769_v12 = vadd.f32 %v2768_v16, %v2767_v50 }
 0x26f   :  { %2770 = vadd.xlane.f32.xlu0 %v2769_v12 }
 0x2da   :  { %v2782_v40 = vpop.xlane.xlu1 %2781 }
 0x2db   :  { %v2783_v23 = vrot.slane %v2782_v40, 4 }
 0x2dd   :  { %v2784_v21 = vadd.f32 %v2783_v23, %v2782_v40 }
 0x2df   :  { %v2785_v13 = vrot.slane %v2784_v21, 2 }
 0x2e1   :  { %v2786_v26 = vadd.f32 %v2785_v13, %v2784_v21 }
 0x2e3   :  { %v2787_v3 = vrot.slane %v2786_v26, 1 }
 0x2e5   :  { %v2788_v30 = vadd.f32 %v2787_v3, %v2786_v26 }
 0x2fc   :  { %v2771_v46 = vpop.xlane.xlu0 %2770 }
 0x2fd   :  { %v2772_v36 = vrot.slane %v2771_v46, 4 }
 0x2ff   :  { %v2773_v15 = vadd.f32 %v2772_v36, %v2771_v46 }
 0x301   :  { %v2774_v53 = vrot.slane %v2773_v15, 2 }
 0x303   :  { %v2775_v17 = vadd.f32 %v2774_v53, %v2773_v15 }
 0x305   :  { %v2776_v43 = vrot.slane %v2775_v17, 1 }
 0x307   :  { %v2777_v24 = vadd.f32 %v2776_v43, %v2775_v17 }
 0x309   :  { %3007 = vpush %v2777_v24 }
 0x30a   :  { %3009 = vpush %v2788_v30 }
 0x33a   :  { %s3008_s17 = spop %3007 }
 0x33b   :  { %s3010_s18 = spop %3009  ;;  %v2779_v5 = vstv %s3008_s17 }
 0x33c   :  { %v2790_v51 = vstv %s3010_s18 }
 0x33d   :  { %v2792_v6 = vmul.f32 %v2791_v33, %v2790_v51 }
 0x33f   :  { %v2793_v29 = vadd.f32 %v2792_v6, %v2779_v5 }
 0x341   :  { %2795 = vst.msk [vmem:[#allocation5] sm:$0x1] %vm2794_vm6, %v2793_v29 }
 0x342   :  { %3210 = shalt.err (!%p3207_p9)
}
 0x343   :  { %s3211_s24 = scalar_lea.hbm %s4492_s6, 16 }
 0x344   :  { %p3212_p10 = scmp.ne.s32.totalorder %s4492_s6, %s3211_s24  ;;  %p3215_p11 = scmp.lt.u32.totalorder %s3211_s24, %s4492_s6 }
 0x346   :  { %p3217_p12 = pnand %p3215_p11, %p3212_p10 }
 0x348   :  { %3220 = shalt.err (!%p3217_p12)
}
 0x349   :  { %2805 = dma.vmem_to_hbm [thread:$0]  %s2803_s20, 16, %s4492_s6, [#allocation3]  }
 0x34a   :  { %3223 = dma.done.wait [#allocation3], 16  }
 0x34b   :  { %3224 = vsyncadd [#allocation3], 4294967280 }
 0x34c   :  { %2809 = vsyncpa [#allocation3], 1 }
 0x34d   :  { %2810 = vsyncpa [#allocation4], 1 }

</bundles_post_ra>
